<compile_context>
chip_gen: v6e
topology: v6e:2x2x1
jax: 0.10.0
libtpu: 0.0.40
codegen_flags: <defaults>
</compile_context>

<pallas_src>
import jax
import jax.numpy as jnp
from jax import lax
from jax.experimental import pallas as pl
from jax.experimental.pallas import tpu as pltpu

_GN_EPS = 1e-5              # nn.GroupNorm default eps
_SQRT_HALF = 0.7071067811865476


def _erf_approx(z):
    # Abramowitz & Stegun 7.1.26 rational approximation (max abs err ~1.5e-7);
    # exp and the approx reciprocal both go to the EUP slot.
    a1, a2, a3, a4, a5 = 0.254829592, -0.284496736, 1.421413741, -1.453152027, 1.061405429
    p = 0.3275911
    az = jnp.abs(z)
    t = pl.reciprocal(1.0 + p * az, approx=True)
    poly = ((((a5 * t + a4) * t + a3) * t + a2) * t + a1) * t
    y = 1.0 - poly * jnp.exp(-az * az)
    return jnp.where(z < 0.0, -y, y)


def _gelu_exact(x):
    # PyTorch nn.GELU() default = erf-based ("exact") GELU.
    return 0.5 * x * (1.0 + _erf_approx(x * _SQRT_HALF))


def _make_fused_kernel(cfgs):
    """Fused kernel for the whole conv stack (one batch element per grid step).

    Ref order: x_ref, then per layer (w_ref[, gamma_ref, beta_ref]), then
    o_ref, then one VMEM scratch per intermediate layer output.
    """
    n_layers = len(cfgs)

    def kernel(*refs):
        pos = 0
        x_ref = refs[pos]; pos += 1
        layer_refs = []
        for cfg in cfgs:
            w_ref = refs[pos]; pos += 1
            if cfg["gn"]:
                g_ref, b_ref = refs[pos], refs[pos + 1]; pos += 2
            else:
                g_ref = b_ref = None
            layer_refs.append((w_ref, g_ref, b_ref))
        o_ref = refs[pos]; pos += 1
        h_refs = refs[pos:]                      # intermediate activations (VMEM)

        src = x_ref                              # (T_in, C_in), time-major
        for i, cfg in enumerate(cfgs):
            w_ref, g_ref, b_ref = layer_refs[i]
            k, s, t_out = cfg["k"], cfg["stride"], cfg["t_out"]

            # In-kernel im2col: build the (t_out, k*C_in) patch (lane concat of
            # k strided-time reads, cast to bf16 ONCE), then a single MXU
            # matmul contracting over K = k*C_in with f32 accumulation.
            taps = [src[pl.ds(j, t_out, s), :] for j in range(k)]
            patch = jnp.concatenate(taps, axis=1).astype(jnp.bfloat16)
            acc = jnp.dot(patch, w_ref[...], preferred_element_type=jnp.float32)

            if g_ref is not None:
                # Fp32GroupNorm with num_groups == num_channels:
                # per-(batch, channel) stats over time, biased variance, f32.
                mean = jnp.mean(acc, axis=0, keepdims=True)
                d = acc - mean
                var = jnp.mean(d * d, axis=0, keepdims=True)
                acc = d * lax.rsqrt(var + _GN_EPS)
                acc = acc * g_ref[...] + b_ref[...]

            acc = _gelu_exact(acc)

            if i < n_layers - 1:
                h_refs[i][...] = acc             # stays resident in VMEM
                src = h_refs[i]
            else:
                o_ref[...] = acc.astype(o_ref.dtype)

    return kernel


def conv_feature_extraction_ch(x_bct, params):
    """Forward pass equivalent to ConvFeatureExtractionChModel.forward.
    x_bct is PyTorch NCT: (B, C_in, T); returns (B, C_out_last, T_out_last)."""
    B, c_in, T = x_bct.shape
    x_btc = jnp.transpose(x_bct, (0, 2, 1))      # (B, T, C_in), channels on lanes

    cfgs = []
    inputs = [x_btc]
    in_specs = [pl.BlockSpec((None, T, c_in), lambda b: (b, 0, 0))]

    t = T
    in_d = c_in
    for layer in params:
        w = layer["w"]                           # PyTorch layout (C_out, C_in, k)
        dim = w.shape[0]
        k = layer["k"]
        s = layer["stride"]
        t_out = (t - k) // s + 1

        # Flattened (k*C_in, C_out) weight slab (tap-major rows to match the
        # in-kernel patch layout), pre-cast to bf16 for the MXU.
        w_flat = jnp.transpose(w, (2, 1, 0)).reshape(k * in_d, dim).astype(jnp.bfloat16)
        inputs.append(w_flat)
        in_specs.append(pl.BlockSpec((k * in_d, dim), lambda b: (0, 0)))

        has_gn = layer["gn"] is not None
        if has_gn:
            gamma, beta = layer["gn"]
            inputs.append(gamma.reshape(1, dim).astype(jnp.float32))
            inputs.append(beta.reshape(1, dim).astype(jnp.float32))
            vspec = pl.BlockSpec((1, dim), lambda b: (0, 0))
            in_specs += [vspec, vspec]

        cfgs.append({"dim": dim, "k": k, "stride": s, "t_out": t_out, "gn": has_gn})
        t = t_out
        in_d = dim

    out_shape = jax.ShapeDtypeStruct((B, t, in_d), jnp.float32)
    out_spec = pl.BlockSpec((None, t, in_d), lambda b: (b, 0, 0))
    # One VMEM scratch per intermediate layer output; activations never leave
    # VMEM between layers.
    scratch_shapes = [pltpu.VMEM((c["t_out"], c["dim"]), jnp.float32)
                      for c in cfgs[:-1]]

    y_btc = pl.pallas_call(
        _make_fused_kernel(cfgs),
        out_shape=out_shape,
        grid=(B,),
        in_specs=in_specs,
        out_specs=out_spec,
        scratch_shapes=scratch_shapes,
        compiler_params=pltpu.CompilerParams(
            dimension_semantics=("parallel",)),   # B>=2 -> both v7x TensorCores
    )(*inputs)

    # Module returns PyTorch NCT layout.
    return jnp.transpose(y_btc, (0, 2, 1))


def init_params(key, in_channels, conv_layers):
    """Deterministic synthetic init matching the module's __init__ shapes.
    Conv weights ~ kaiming_normal_ (fan_in, gain=sqrt(2)); GroupNorm affine =
    (ones, zeros) as in nn.GroupNorm default."""
    params = []
    in_d = in_channels
    for i, (dim, k, stride) in enumerate(conv_layers):
        key, wk = jax.random.split(key)
        fan_in = in_d * k
        std = (2.0 / fan_in) ** 0.5
        w = jax.random.normal(wk, (dim, in_d, k), jnp.float32) * std  # (O, I, K)
        gn = (jnp.ones((dim,), jnp.float32), jnp.zeros((dim,), jnp.float32)) if i == 0 else None
        params.append({"w": w, "k": k, "stride": stride, "gn": gn})
        in_d = dim
    return params


def _reference(x_bct, params):
    """Pure-JAX f32 reference of the PyTorch forward (sanity check)."""
    y = x_bct
    for layer in params:
        y = lax.conv_general_dilated(
            y, layer["w"], window_strides=(layer["stride"],), padding="VALID",
            dimension_numbers=("NCH", "OIH", "NCH"),
            precision=lax.Precision.HIGHEST)
        if layer["gn"] is not None:
            gamma, beta = layer["gn"]
            mean = jnp.mean(y, axis=2, keepdims=True)
            d = y - mean
            var = jnp.mean(d * d, axis=2, keepdims=True)
            y = d * lax.rsqrt(var + _GN_EPS)
            y = y * gamma[None, :, None] + beta[None, :, None]
        y = jax.nn.gelu(y, approximate=False)
    return y


if __name__ == "__main__":
    # Module config: ConvFeatureExtractionChModel(in_channels=4,
    #   conv_layers=[(128, 3, 2), (128, 3, 2)], dropout=0.0, mode='default',
    #   conv_bias=False, conv_groups=1).  dim=128 keeps the channel (lane) axis
    # dense, as in real wav2vec2 (dim=512).
    in_channels = 4
    conv_layers = [(128, 3, 2), (128, 3, 2)]
    B, T = 2, 256

    key = jax.random.PRNGKey(0)
    key, xk = jax.random.split(key)
    x = jax.random.normal(xk, (B, in_channels, T), jnp.float32)   # (B, C_in, T)
    params = init_params(key, in_channels, conv_layers)

    out = jax.block_until_ready(conv_feature_extraction_ch(x, params))
    ref = jax.block_until_ready(_reference(x, params))

    # T=256 -> t_out 127 -> 63
    assert out.shape == ref.shape == (B, conv_layers[-1][0], 63), out.shape
    # Kernel uses bf16 MXU multiplicands (f32 accumulate); the reference is
    # full f32, so tolerance is loosened (~0.4% relative bf16 rounding drift,
    # compounding through the stack; structural bugs would give O(1) errors).
    if not jnp.allclose(out, ref, atol=5e-2, rtol=5e-2):
        max_err = float(jnp.max(jnp.abs(out - ref)))
        raise AssertionError(f"kernel vs reference mismatch, max abs err = {max_err}")
    print("KERNEL_OK")
</pallas_src>

<mosaic_0001>
module attributes {stable_mosaic.version = 11 : i64} {
  func.func @kernel(%arg0: i32, %arg1: memref<1x256x4xf32, #tpu.memory_space<vmem>>, %arg2: memref<12x128xbf16, #tpu.memory_space<vmem>>, %arg3: memref<1x128xf32, #tpu.memory_space<vmem>>, %arg4: memref<1x128xf32, #tpu.memory_space<vmem>>, %arg5: memref<384x128xbf16, #tpu.memory_space<vmem>>, %arg6: memref<1x63x128xf32, #tpu.memory_space<vmem>>, %arg7: memref<127x128xf32, #tpu.memory_space<vmem>>) attributes {dimension_semantics = [#tpu.dimension_semantics<parallel>], iteration_bounds = array<i64: 2>, scalar_prefetch = 0 : i64, scratch_operands = 1 : i64, tpu.core_type = #tpu.core_type<tc>, window_params = [{transform_indices = @transform_0, window_bounds = array<i64: 1, 256, 4>}, {pipeline_mode = #tpu.pipeline_mode<synchronous>, transform_indices = @transform_1, window_bounds = array<i64: 12, 128>}, {pipeline_mode = #tpu.pipeline_mode<synchronous>, transform_indices = @transform_2, window_bounds = array<i64: 1, 128>}, {pipeline_mode = #tpu.pipeline_mode<synchronous>, transform_indices = @transform_3, window_bounds = array<i64: 1, 128>}, {pipeline_mode = #tpu.pipeline_mode<synchronous>, transform_indices = @transform_4, window_bounds = array<i64: 384, 128>}, {transform_indices = @transform_5, window_bounds = array<i64: 1, 63, 128>}]} {
    %c0 = arith.constant 0 : index
    %c0_0 = arith.constant 0 : index
    %c0_1 = arith.constant 0 : index
    %0 = tpu.strided_load %arg1[%c0, %c0_0, %c0_1] {strides = array<i32: 1, 2, 1>} : memref<1x256x4xf32, #tpu.memory_space<vmem>>, vector<1x127x4xf32>
    %1 = vector.shape_cast %0 : vector<1x127x4xf32> to vector<127x4xf32>
    %c0_2 = arith.constant 0 : index
    %c1 = arith.constant 1 : index
    %c0_3 = arith.constant 0 : index
    %2 = tpu.strided_load %arg1[%c0_2, %c1, %c0_3] {strides = array<i32: 1, 2, 1>} : memref<1x256x4xf32, #tpu.memory_space<vmem>>, vector<1x127x4xf32>
    %3 = vector.shape_cast %2 : vector<1x127x4xf32> to vector<127x4xf32>
    %c0_4 = arith.constant 0 : index
    %c2 = arith.constant 2 : index
    %c0_5 = arith.constant 0 : index
    %4 = tpu.strided_load %arg1[%c0_4, %c2, %c0_5] {strides = array<i32: 1, 2, 1>} : memref<1x256x4xf32, #tpu.memory_space<vmem>>, vector<1x127x4xf32>
    %5 = vector.shape_cast %4 : vector<1x127x4xf32> to vector<127x4xf32>
    %6 = tpu.concatenate %1, %3, %5 in 1 : vector<127x4xf32>, vector<127x4xf32>, vector<127x4xf32> -> vector<127x12xf32>
    %7 = arith.truncf %6 : vector<127x12xf32> to vector<127x12xbf16>
    %c0_6 = arith.constant 0 : index
    %c0_7 = arith.constant 0 : index
    %8 = vector.load %arg2[%c0_6, %c0_7] : memref<12x128xbf16, #tpu.memory_space<vmem>>, vector<12x128xbf16>
    %cst = arith.constant dense<0.000000e+00> : vector<127x128xf32>
    %9 = tpu.matmul %7, %8, %cst {dimension_numbers = #tpu.dot_dimension_numbers<[1], [0], [0], [1], [0, 0, 1, 1], [], []>} : vector<127x12xbf16>, vector<12x128xbf16>, vector<127x128xf32> -> vector<127x128xf32>
    %cst_8 = arith.constant dense<0.000000e+00> : vector<128xf32>
    %10 = vector.multi_reduction <add>, %9, %cst_8 [0] : vector<127x128xf32> to vector<128xf32>
    %11 = vector.shape_cast %10 : vector<128xf32> to vector<1x128xf32>
    %cst_9 = arith.constant 1.270000e+02 : f32
    %12 = vector.broadcast %cst_9 : f32 to vector<1x128xf32>
    %13 = arith.divf %11, %12 : vector<1x128xf32>
    %14 = vector.broadcast %13 : vector<1x128xf32> to vector<127x128xf32>
    %15 = arith.subf %9, %14 : vector<127x128xf32>
    %16 = arith.mulf %15, %15 : vector<127x128xf32>
    %cst_10 = arith.constant dense<0.000000e+00> : vector<128xf32>
    %17 = vector.multi_reduction <add>, %16, %cst_10 [0] : vector<127x128xf32> to vector<128xf32>
    %18 = vector.shape_cast %17 : vector<128xf32> to vector<1x128xf32>
    %cst_11 = arith.constant 1.270000e+02 : f32
    %19 = vector.broadcast %cst_11 : f32 to vector<1x128xf32>
    %20 = arith.divf %18, %19 : vector<1x128xf32>
    %cst_12 = arith.constant 9.99999974E-6 : f32
    %21 = vector.broadcast %cst_12 : f32 to vector<1x128xf32>
    %22 = arith.addf %20, %21 : vector<1x128xf32>
    %23 = math.rsqrt %22 : vector<1x128xf32>
    %24 = vector.broadcast %23 : vector<1x128xf32> to vector<127x128xf32>
    %25 = arith.mulf %15, %24 : vector<127x128xf32>
    %c0_13 = arith.constant 0 : index
    %c0_14 = arith.constant 0 : index
    %26 = vector.load %arg3[%c0_13, %c0_14] : memref<1x128xf32, #tpu.memory_space<vmem>>, vector<1x128xf32>
    %27 = vector.broadcast %26 : vector<1x128xf32> to vector<127x128xf32>
    %28 = arith.mulf %25, %27 : vector<127x128xf32>
    %c0_15 = arith.constant 0 : index
    %c0_16 = arith.constant 0 : index
    %29 = vector.load %arg4[%c0_15, %c0_16] : memref<1x128xf32, #tpu.memory_space<vmem>>, vector<1x128xf32>
    %30 = vector.broadcast %29 : vector<1x128xf32> to vector<127x128xf32>
    %31 = arith.addf %28, %30 : vector<127x128xf32>
    %cst_17 = arith.constant 5.000000e-01 : f32
    %32 = vector.broadcast %cst_17 : f32 to vector<127x128xf32>
    %33 = arith.mulf %32, %31 : vector<127x128xf32>
    %cst_18 = arith.constant 0.707106769 : f32
    %34 = vector.broadcast %cst_18 : f32 to vector<127x128xf32>
    %35 = arith.mulf %31, %34 : vector<127x128xf32>
    %36 = math.absf %35 : vector<127x128xf32>
    %cst_19 = arith.constant 0.327591091 : f32
    %37 = vector.broadcast %cst_19 : f32 to vector<127x128xf32>
    %38 = arith.mulf %37, %36 : vector<127x128xf32>
    %cst_20 = arith.constant 1.000000e+00 : f32
    %39 = vector.broadcast %cst_20 : f32 to vector<127x128xf32>
    %40 = arith.addf %39, %38 : vector<127x128xf32>
    %41 = tpu.reciprocal %40 {approx = true} : vector<127x128xf32> -> vector<127x128xf32>
    %cst_21 = arith.constant 1.06140542 : f32
    %42 = vector.broadcast %cst_21 : f32 to vector<127x128xf32>
    %43 = arith.mulf %42, %41 : vector<127x128xf32>
    %cst_22 = arith.constant -1.45315206 : f32
    %44 = vector.broadcast %cst_22 : f32 to vector<127x128xf32>
    %45 = arith.addf %43, %44 : vector<127x128xf32>
    %46 = arith.mulf %45, %41 : vector<127x128xf32>
    %cst_23 = arith.constant 1.42141378 : f32
    %47 = vector.broadcast %cst_23 : f32 to vector<127x128xf32>
    %48 = arith.addf %46, %47 : vector<127x128xf32>
    %49 = arith.mulf %48, %41 : vector<127x128xf32>
    %cst_24 = arith.constant -0.284496725 : f32
    %50 = vector.broadcast %cst_24 : f32 to vector<127x128xf32>
    %51 = arith.addf %49, %50 : vector<127x128xf32>
    %52 = arith.mulf %51, %41 : vector<127x128xf32>
    %cst_25 = arith.constant 0.254829586 : f32
    %53 = vector.broadcast %cst_25 : f32 to vector<127x128xf32>
    %54 = arith.addf %52, %53 : vector<127x128xf32>
    %55 = arith.mulf %54, %41 : vector<127x128xf32>
    %cst_26 = arith.constant 0.000000e+00 : f32
    %56 = vector.broadcast %cst_26 : f32 to vector<127x128xf32>
    %57 = arith.subf %56, %36 : vector<127x128xf32>
    %58 = arith.mulf %57, %36 : vector<127x128xf32>
    %59 = math.exp %58 : vector<127x128xf32>
    %60 = arith.mulf %55, %59 : vector<127x128xf32>
    %cst_27 = arith.constant 1.000000e+00 : f32
    %61 = vector.broadcast %cst_27 : f32 to vector<127x128xf32>
    %62 = arith.subf %61, %60 : vector<127x128xf32>
    %cst_28 = arith.constant 0.000000e+00 : f32
    %63 = vector.broadcast %cst_28 : f32 to vector<127x128xf32>
    %64 = arith.cmpf olt, %35, %63 : vector<127x128xf32>
    %cst_29 = arith.constant 0.000000e+00 : f32
    %65 = vector.broadcast %cst_29 : f32 to vector<127x128xf32>
    %66 = arith.subf %65, %62 : vector<127x128xf32>
    %67 = arith.select %64, %66, %62 : vector<127x128xi1>, vector<127x128xf32>
    %cst_30 = arith.constant 1.000000e+00 : f32
    %68 = vector.broadcast %cst_30 : f32 to vector<127x128xf32>
    %69 = arith.addf %68, %67 : vector<127x128xf32>
    %70 = arith.mulf %33, %69 : vector<127x128xf32>
    %c0_31 = arith.constant 0 : index
    %c0_32 = arith.constant 0 : index
    %71 = vector.load %arg7[%c0_31, %c0_32] : memref<127x128xf32, #tpu.memory_space<vmem>>, vector<127x128xf32>
    tpu.vector_store %arg7[%c0_31, %c0_32], %70 {strides = array<i32>} : memref<127x128xf32, #tpu.memory_space<vmem>>, vector<127x128xf32>,
    %c0_33 = arith.constant 0 : index
    %c0_34 = arith.constant 0 : index
    %72 = tpu.strided_load %arg7[%c0_33, %c0_34] {strides = array<i32: 2, 1>} : memref<127x128xf32, #tpu.memory_space<vmem>>, vector<63x128xf32>
    %c1_35 = arith.constant 1 : index
    %c0_36 = arith.constant 0 : index
    %73 = tpu.strided_load %arg7[%c1_35, %c0_36] {strides = array<i32: 2, 1>} : memref<127x128xf32, #tpu.memory_space<vmem>>, vector<63x128xf32>
    %c2_37 = arith.constant 2 : index
    %c0_38 = arith.constant 0 : index
    %74 = tpu.strided_load %arg7[%c2_37, %c0_38] {strides = array<i32: 2, 1>} : memref<127x128xf32, #tpu.memory_space<vmem>>, vector<63x128xf32>
    %75 = tpu.concatenate %72, %73, %74 in 1 : vector<63x128xf32>, vector<63x128xf32>, vector<63x128xf32> -> vector<63x384xf32>
    %76 = arith.truncf %75 : vector<63x384xf32> to vector<63x384xbf16>
    %c0_39 = arith.constant 0 : index
    %c0_40 = arith.constant 0 : index
    %77 = vector.load %arg5[%c0_39, %c0_40] : memref<384x128xbf16, #tpu.memory_space<vmem>>, vector<384x128xbf16>
    %cst_41 = arith.constant dense<0.000000e+00> : vector<63x128xf32>
    %78 = tpu.matmul %76, %77, %cst_41 {dimension_numbers = #tpu.dot_dimension_numbers<[1], [0], [0], [1], [0, 0, 1, 1], [], []>} : vector<63x384xbf16>, vector<384x128xbf16>, vector<63x128xf32> -> vector<63x128xf32>
    %cst_42 = arith.constant 5.000000e-01 : f32
    %79 = vector.broadcast %cst_42 : f32 to vector<63x128xf32>
    %80 = arith.mulf %79, %78 : vector<63x128xf32>
    %cst_43 = arith.constant 0.707106769 : f32
    %81 = vector.broadcast %cst_43 : f32 to vector<63x128xf32>
    %82 = arith.mulf %78, %81 : vector<63x128xf32>
    %83 = math.absf %82 : vector<63x128xf32>
    %cst_44 = arith.constant 0.327591091 : f32
    %84 = vector.broadcast %cst_44 : f32 to vector<63x128xf32>
    %85 = arith.mulf %84, %83 : vector<63x128xf32>
    %cst_45 = arith.constant 1.000000e+00 : f32
    %86 = vector.broadcast %cst_45 : f32 to vector<63x128xf32>
    %87 = arith.addf %86, %85 : vector<63x128xf32>
    %88 = tpu.reciprocal %87 {approx = true} : vector<63x128xf32> -> vector<63x128xf32>
    %cst_46 = arith.constant 1.06140542 : f32
    %89 = vector.broadcast %cst_46 : f32 to vector<63x128xf32>
    %90 = arith.mulf %89, %88 : vector<63x128xf32>
    %cst_47 = arith.constant -1.45315206 : f32
    %91 = vector.broadcast %cst_47 : f32 to vector<63x128xf32>
    %92 = arith.addf %90, %91 : vector<63x128xf32>
    %93 = arith.mulf %92, %88 : vector<63x128xf32>
    %cst_48 = arith.constant 1.42141378 : f32
    %94 = vector.broadcast %cst_48 : f32 to vector<63x128xf32>
    %95 = arith.addf %93, %94 : vector<63x128xf32>
    %96 = arith.mulf %95, %88 : vector<63x128xf32>
    %cst_49 = arith.constant -0.284496725 : f32
    %97 = vector.broadcast %cst_49 : f32 to vector<63x128xf32>
    %98 = arith.addf %96, %97 : vector<63x128xf32>
    %99 = arith.mulf %98, %88 : vector<63x128xf32>
    %cst_50 = arith.constant 0.254829586 : f32
    %100 = vector.broadcast %cst_50 : f32 to vector<63x128xf32>
    %101 = arith.addf %99, %100 : vector<63x128xf32>
    %102 = arith.mulf %101, %88 : vector<63x128xf32>
    %cst_51 = arith.constant 0.000000e+00 : f32
    %103 = vector.broadcast %cst_51 : f32 to vector<63x128xf32>
    %104 = arith.subf %103, %83 : vector<63x128xf32>
    %105 = arith.mulf %104, %83 : vector<63x128xf32>
    %106 = math.exp %105 : vector<63x128xf32>
    %107 = arith.mulf %102, %106 : vector<63x128xf32>
    %cst_52 = arith.constant 1.000000e+00 : f32
    %108 = vector.broadcast %cst_52 : f32 to vector<63x128xf32>
    %109 = arith.subf %108, %107 : vector<63x128xf32>
    %cst_53 = arith.constant 0.000000e+00 : f32
    %110 = vector.broadcast %cst_53 : f32 to vector<63x128xf32>
    %111 = arith.cmpf olt, %82, %110 : vector<63x128xf32>
    %cst_54 = arith.constant 0.000000e+00 : f32
    %112 = vector.broadcast %cst_54 : f32 to vector<63x128xf32>
    %113 = arith.subf %112, %109 : vector<63x128xf32>
    %114 = arith.select %111, %113, %109 : vector<63x128xi1>, vector<63x128xf32>
    %cst_55 = arith.constant 1.000000e+00 : f32
    %115 = vector.broadcast %cst_55 : f32 to vector<63x128xf32>
    %116 = arith.addf %115, %114 : vector<63x128xf32>
    %117 = arith.mulf %80, %116 : vector<63x128xf32>
    %c0_56 = arith.constant 0 : index
    %c0_57 = arith.constant 0 : index
    %c0_58 = arith.constant 0 : index
    %118 = vector.load %arg6[%c0_56, %c0_57, %c0_58] : memref<1x63x128xf32, #tpu.memory_space<vmem>>, vector<1x63x128xf32>
    %119 = vector.shape_cast %118 : vector<1x63x128xf32> to vector<63x128xf32>
    %120 = vector.shape_cast %117 : vector<63x128xf32> to vector<1x63x128xf32>
    tpu.vector_store %arg6[%c0_56, %c0_57, %c0_58], %120 {strides = array<i32>} : memref<1x63x128xf32, #tpu.memory_space<vmem>>, vector<1x63x128xf32>,
    return
  }
  func.func @transform_0(%arg0: i32) -> (i32, i32, i32) {
    %c0_i32 = arith.constant 0 : i32
    %c0_i32_0 = arith.constant 0 : i32
    %c0_i32_1 = arith.constant 0 : i32
    return %arg0, %c0_i32, %c0_i32_0 : i32, i32, i32
  }
  func.func @transform_1(%arg0: i32) -> (i32, i32) {
    %c0_i32 = arith.constant 0 : i32
    %c0_i32_0 = arith.constant 0 : i32
    %c0_i32_1 = arith.constant 0 : i32
    return %c0_i32, %c0_i32_0 : i32, i32
  }
  func.func @transform_2(%arg0: i32) -> (i32, i32) {
    %c0_i32 = arith.constant 0 : i32
    %c0_i32_0 = arith.constant 0 : i32
    %c0_i32_1 = arith.constant 0 : i32
    return %c0_i32, %c0_i32_0 : i32, i32
  }
  func.func @transform_3(%arg0: i32) -> (i32, i32) {
    %c0_i32 = arith.constant 0 : i32
    %c0_i32_0 = arith.constant 0 : i32
    %c0_i32_1 = arith.constant 0 : i32
    return %c0_i32, %c0_i32_0 : i32, i32
  }
  func.func @transform_4(%arg0: i32) -> (i32, i32) {
    %c0_i32 = arith.constant 0 : i32
    %c0_i32_0 = arith.constant 0 : i32
    %c0_i32_1 = arith.constant 0 : i32
    return %c0_i32, %c0_i32_0 : i32, i32
  }
  func.func @transform_5(%arg0: i32) -> (i32, i32, i32) {
    %c0_i32 = arith.constant 0 : i32
    %c0_i32_0 = arith.constant 0 : i32
    %c0_i32_1 = arith.constant 0 : i32
    return %arg0, %c0_i32, %c0_i32_0 : i32, i32, i32
  }
}

</mosaic_0001>

<bundles_post_ra>
// kernel: tpu_custom_call.1
= control target key start
LH: loop header
LB: loop body
LE: loop exit
PB: predicated region body
PF: predicated region fallthrough
CT: control target
= control target key end

     0   :  { %s2304_s18 = smov 0   ;;  %s3108_s0 = inlined_call_operand.vmem [shape: f32[2,256,4], index: 0, kind: input, shape index: {}]   ;;  %s3109_s1 = inlined_call_operand.vmem [shape: bf16[12,128], index: 1, kind: input, shape index: {}]   ;;  %s3110_s2 = inlined_call_operand.vmem [shape: f32[1,128], index: 2, kind: input, shape index: {}]   ;;  %s3111_s3 = inlined_call_operand.vmem [shape: f32[1,128], index: 3, kind: input, shape index: {}]   ;;  %s3112_s4 = inlined_call_operand.vmem [shape: bf16[384,128], index: 4, kind: input, shape index: {}]   ;;  %s3113_s5 = inlined_call_operand.vmem [shape: f32[2,63,128], index: 5, kind: output, shape index: {}]  }
   0x1 LB: > { %s1852_s19 = sadd.s32 4294967295, %s2270_s18   ;;  %p1856_p0 = scmp.ge.s32.totalorder %s2270_s18, 1  ;;  %s2270_s18 = sphi %s2304_s18, %s15_s18  }
   0x2   : > { %p187_p1 = scmp.lt.s32.totalorder %s2270_s18, 3 }
   0x4   : > { %p188_p2 = pnand %p1856_p0, %p187_p1 }
   0x6   : > { %191 = sbr.rel (%p188_p2) target bundleno = 880 (0x370), region = 40 }
   0xb   : > { %p215_p3 = scmp.lt.s32.totalorder %s1852_s19, 1  ;;  %v2141_v0 = vld [vmem:[%s3109_s1] sm:$0x3f]   ;;  %vm523_vm0 = vcmask 1045504   ;;  %s2272_s26 = smov 8   ;;  %vm449_vm1 = vcmask 31744  }
   0xc   : > { %2050 = vmatprep.subr.msk.bf16.mxu0 %vm523_vm0, %v2141_v0  ;;  %v525_v1 = vsel %vm523_vm0, %v2141_v0, 0  ;;  %s2273_s27 = smov 4   ;;  %vm466_vm2 = vcmask 64512   ;;  %vm498_vm3 = vcmask 97280   ;;  %vm638_vm4 = vcmask 1046528  }
   0xd   : > { %s3163_s19 = smov (!%p215_p3, %s1852_s19), 1  ;;  %2009 = vmatpush3.bf16.msra.mxu0 %v525_v1 }
   0xe   : > { %s1945_s22 = sshll.u32 %s3163_s19, 8  ;;  %s1946_s9 = sshll.u32 %s3163_s19, 6 }
   0xf   : > { %s2321_s25 = scalar_lea.vmem %s3108_s0, %s1945_s22  ;;  %s3062_s11 = scalar_lea.vmem %s3113_s5, %s1946_s9 }
  0x10   : > { %v1892_v2 = vld [vmem:[%s2321_s25 + $0x2] ss:$2 sm:$0xff]  ;;  %v1893_v3 = vld [vmem:[%s2321_s25 + $0x12] ss:$2 sm:$0xff]  ;;  %v1876_v4 = vld [vmem:[%s2321_s25 + $0x1] ss:$2 sm:$0xff] }
  0x11   : > { %v2071_v5 = vpack.i.bf16 %v1893_v3, %v1892_v2  ;;  %v1877_v6 = vld [vmem:[%s2321_s25 + $0x11] ss:$2 sm:$0xff]  ;;  %v1894_v7 = vld [vmem:[%s2321_s25 + $0x22] ss:$2 sm:$0xff]  ;;  %v1895_v8 = vld [vmem:[%s2321_s25 + $0x32] ss:$2 sm:$0xff] }
  0x12   : > { %v2061_v9 = vpack.i.bf16 %v1877_v6, %v1876_v4  ;;  %v1878_v10 = vld [vmem:[%s2321_s25 + $0x21] ss:$2 sm:$0xff]  ;;  %v1879_v11 = vld [vmem:[%s2321_s25 + $0x31] ss:$2 sm:$0xff]  ;;  %v2076_v12 = vpack.i.bf16 %v1895_v8, %v1894_v7  ;;  %v1898_v20 = vld [vmem:[%s2321_s25 + $0x62] ss:$2 sm:$0xff] }
  0x13   : > { %2072 = vrot.lane.b32.xlu1 %v2071_v5, %s2272_s26  ;;  %v2066_v13 = vpack.i.bf16 %v1879_v11, %v1878_v10  ;;  %v1882_v14 = vld [vmem:[%s2321_s25 + $0x61] ss:$2 sm:$0xff]  ;;  %v1883_v15 = vld [vmem:[%s2321_s25 + $0x71] ss:$2 sm:$0xff]  ;;  %v1899_v21 = vld [vmem:[%s2321_s25 + $0x72] ss:$2 sm:$0xff] }
  0x14   : > { %2062 = vrot.lane.b32.xlu0 %v2061_v9, %s2273_s27  ;;  %v1880_v16 = vld [vmem:[%s2321_s25 + $0x41] ss:$2 sm:$0xff]  ;;  %v1881_v17 = vld [vmem:[%s2321_s25 + $0x51] ss:$2 sm:$0xff]  ;;  %v2086_v18 = vpack.i.bf16 %v1883_v15, %v1882_v14  ;;  %v1896_v22 = vld [vmem:[%s2321_s25 + $0x42] ss:$2 sm:$0xff]  ;;  %v2096_v24 = vpack.i.bf16 %v1899_v21, %v1898_v20 }
  0x15   : > { %v2081_v19 = vpack.i.bf16 %v1881_v17, %v1880_v16  ;;  %v1897_v23 = vld [vmem:[%s2321_s25 + $0x52] ss:$2 sm:$0xff]  ;;  %v1886_v26 = vld [vmem:[%s2321_s25 + $0xa1] ss:$2 sm:$0xff]  ;;  %v1887_v27 = vld [vmem:[%s2321_s25 + $0xb1] ss:$2 sm:$0xff] }
  0x16   : > { %v2091_v25 = vpack.i.bf16 %v1897_v23, %v1896_v22  ;;  %v1884_v28 = vld [vmem:[%s2321_s25 + $0x81] ss:$2 sm:$0xff]  ;;  %v1885_v29 = vld [vmem:[%s2321_s25 + $0x91] ss:$2 sm:$0xff]  ;;  %v2106_v30 = vpack.i.bf16 %v1887_v27, %v1886_v26  ;;  %v1902_v32 = vld [vmem:[%s2321_s25 + $0xa2] ss:$2 sm:$0xff] }
  0x17   : > { %2077 = vrot.lane.b32.xlu1 %v2076_v12, %s2272_s26  ;;  %v2101_v31 = vpack.i.bf16 %v1885_v29, %v1884_v28  ;;  %v1903_v33 = vld [vmem:[%s2321_s25 + $0xb2] ss:$2 sm:$0xff]  ;;  %v1900_v34 = vld [vmem:[%s2321_s25 + $0x82] ss:$2 sm:$0xff]  ;;  %v1890_v36 = vld [vmem:[%s2321_s25 + $0xe1] ss:$2 sm:$0xff] }
  0x18   : > { %2067 = vrot.lane.b32.xlu0 %v2066_v13, %s2273_s27  ;;  %v1901_v35 = vld [vmem:[%s2321_s25 + $0x92] ss:$2 sm:$0xff]  ;;  %v1891_v37 = vld [vmem:[%s2321_s25 + $0xf1] ss:$2 sm:$0x7f]  ;;  %v2116_v38 = vpack.i.bf16 %v1903_v33, %v1902_v32 }
  0x19   : > { %v1888_v39 = vld [vmem:[%s2321_s25 + $0xc1] ss:$2 sm:$0xff]  ;;  %v1889_v40 = vld [vmem:[%s2321_s25 + $0xd1] ss:$2 sm:$0xff]  ;;  %v2111_v41 = vpack.i.bf16 %v1901_v35, %v1900_v34  ;;  %v1906_v42 = vld [vmem:[%s2321_s25 + $0xe2] ss:$2 sm:$0xff]  ;;  %v2126_v44 = vpack.i.bf16 %v1891_v37, %v1890_v36 }
  0x1a   : > { %v1907_v43 = vld [vmem:[%s2321_s25 + $0xf2] ss:$2 sm:$0x7f]  ;;  %v1904_v45 = vld [vmem:[%s2321_s25 + $0xc2] ss:$2 sm:$0xff]  ;;  %v2121_v47 = vpack.i.bf16 %v1889_v40, %v1888_v39 }
  0x1b   : > { %2087 = vrot.lane.b32.xlu1 %v2086_v18, %s2273_s27  ;;  %v1905_v46 = vld [vmem:[%s2321_s25 + $0xd2] ss:$2 sm:$0xff]  ;;  %v2136_v48 = vpack.i.bf16 %v1907_v43, %v1906_v42 }
  0x1c   : > { %2082 = vrot.lane.b32.xlu0 %v2081_v19, %s2273_s27  ;;  %v2131_v49 = vpack.i.bf16 %v1905_v46, %v1904_v45  ;;  %v226_v54 = vld [vmem:[%s2321_s25] ss:$2 sm:$0xff]  ;;  %v1861_v55 = vld [vmem:[%s2321_s25 + $0x10] ss:$2 sm:$0xff] }
  0x1d   : > { %v1862_v0 = vld [vmem:[%s2321_s25 + $0x20] ss:$2 sm:$0xff]  ;;  %v1863_v1 = vld [vmem:[%s2321_s25 + $0x30] ss:$2 sm:$0xff] }
  0x1e   : > { %v1866_v16 = vld [vmem:[%s2321_s25 + $0x60] ss:$2 sm:$0xff]  ;;  %v1867_v17 = vld [vmem:[%s2321_s25 + $0x70] ss:$2 sm:$0xff] }
  0x1f   : > { %2097 = vrot.lane.b32.xlu1 %v2096_v24, %s2272_s26  ;;  %v1864_v20 = vld [vmem:[%s2321_s25 + $0x40] ss:$2 sm:$0xff]  ;;  %v1865_v21 = vld [vmem:[%s2321_s25 + $0x50] ss:$2 sm:$0xff] }
  0x20   : > { %2092 = vrot.lane.b32.xlu0 %v2091_v25, %s2272_s26  ;;  %v1870_v42 = vld [vmem:[%s2321_s25 + $0xa0] ss:$2 sm:$0xff]  ;;  %v1871_v43 = vld [vmem:[%s2321_s25 + $0xb0] ss:$2 sm:$0xff] }
  0x21   : > { %v1868_v46 = vld [vmem:[%s2321_s25 + $0x80] ss:$2 sm:$0xff] }
  0x23   : > { %2107 = vrot.lane.b32.xlu1 %v2106_v30, %s2273_s27 }
  0x24   : > { %2102 = vrot.lane.b32.xlu0 %v2101_v31, %s2273_s27 }
  0x27   : > { %2117 = vrot.lane.b32.xlu1 %v2116_v38, %s2272_s26 }
  0x28   : > { %2112 = vrot.lane.b32.xlu0 %v2111_v41, %s2272_s26 }
  0x2b   : > { %2127 = vrot.lane.b32.xlu1 %v2126_v44, %s2273_s27 }
  0x2c   : > { %2122 = vrot.lane.b32.xlu0 %v2121_v47, %s2273_s27  ;;  %v1869_v47 = vld [vmem:[%s2321_s25 + $0x90] ss:$2 sm:$0xff] }
  0x2f   : > { %2137 = vrot.lane.b32.xlu1 %v2136_v48, %s2272_s26 }
  0x30   : > { %2132 = vrot.lane.b32.xlu0 %v2131_v49, %s2272_s26 }
  0x85   : > { %v2073_v50 = vpop.permute.xlu1 %2072 }
  0x86   : > { %v2075_v51 = vunpack.i.h.bf16 %v2073_v50  ;;  %v2074_v52 = vunpack.i.l.bf16 %v2073_v50  ;;  %v2063_v53 = vpop.permute.xlu0 %2062 }
  0x87   : > { %v2065_v56 = vunpack.i.h.bf16 %v2063_v53  ;;  %v2064_v57 = vunpack.i.l.bf16 %v2063_v53 }
  0x89   : > { %v2078_v58 = vpop.permute.xlu1 %2077  ;;  %v450_v59 = vsel %vm449_vm1, %v226_v54, %v2064_v57  ;;  %v451_v60 = vsel %vm449_vm1, %v1861_v55, %v2065_v56 }
  0x8a   : > { %v2080_v61 = vunpack.i.h.bf16 %v2078_v58  ;;  %v2079_v62 = vunpack.i.l.bf16 %v2078_v58  ;;  %v2068_v63 = vpop.permute.xlu0 %2067  ;;  %v467_v2 = vsel %vm466_vm2, %v450_v59, %v2074_v52  ;;  %v468_v3 = vsel %vm466_vm2, %v451_v60, %v2075_v51 }
  0x8b   : > { %v2070_v4 = vunpack.i.h.bf16 %v2068_v63  ;;  %v2069_v5 = vunpack.i.l.bf16 %v2068_v63  ;;  %v483_v6 = vpack.c.bf16 %v468_v3, %v467_v2 }
  0x8d   : > { %v452_v7 = vsel %vm449_vm1, %v1862_v0, %v2069_v5  ;;  %v453_v8 = vsel %vm449_vm1, %v1863_v1, %v2070_v4  ;;  %2010 = vmatprep.mubr.msk.bf16.mxu0 %vm498_vm3, %v483_v6  ;;  %v2088_v9 = vpop.permute.xlu1 %2087  ;;  %v1874_v4 = vld [vmem:[%s2321_s25 + $0xe0] ss:$2 sm:$0xff]  ;;  %v1875_v5 = vld [vmem:[%s2321_s25 + $0xf0] ss:$2 sm:$0x7f] }
  0x8e   : > { %v2083_v10 = vpop.permute.xlu0 %2082  ;;  %v469_v11 = vsel %vm466_vm2, %v452_v7, %v2079_v62  ;;  %v470_v12 = vsel %vm466_vm2, %v453_v8, %v2080_v61  ;;  %v2090_v13 = vunpack.i.h.bf16 %v2088_v9  ;;  %v2089_v14 = vunpack.i.l.bf16 %v2088_v9  ;;  %v1872_v8 = vld [vmem:[%s2321_s25 + $0xc0] ss:$2 sm:$0xff]  ;;  %v1873_v9 = vld [vmem:[%s2321_s25 + $0xd0] ss:$2 sm:$0xff] }
  0x8f   : > { %v484_v15 = vpack.c.bf16 %v470_v12, %v469_v11  ;;  %v2085_v18 = vunpack.i.h.bf16 %v2083_v10  ;;  %v2084_v19 = vunpack.i.l.bf16 %v2083_v10 }
  0x90   : > { %v456_v26 = vsel %vm449_vm1, %v1866_v16, %v2089_v14  ;;  %v457_v27 = vsel %vm449_vm1, %v1867_v17, %v2090_v13 }
  0x91   : > { %2011 = vmatmul.mubr.msk.bf16.vlgmr.msra.gmra.mxu0 %vm498_vm3, %v484_v15  ;;  %v2098_v22 = vpop.permute.xlu1 %2097  ;;  %v454_v30 = vsel %vm449_vm1, %v1864_v20, %v2084_v19  ;;  %v455_v31 = vsel %vm449_vm1, %v1865_v21, %v2085_v18 }
  0x92   : > { %v2100_v23 = vunpack.i.h.bf16 %v2098_v22  ;;  %v2099_v24 = vunpack.i.l.bf16 %v2098_v22  ;;  %v2093_v25 = vpop.permute.xlu0 %2092 }
  0x93   : > { %v2095_v28 = vunpack.i.h.bf16 %v2093_v25  ;;  %v2094_v29 = vunpack.i.l.bf16 %v2093_v25 }
  0x94   : > { %v473_v32 = vsel %vm466_vm2, %v456_v26, %v2099_v24  ;;  %v474_v33 = vsel %vm466_vm2, %v457_v27, %v2100_v23 }
  0x95   : > { %v486_v34 = vpack.c.bf16 %v474_v33, %v473_v32  ;;  %v471_v35 = vsel %vm466_vm2, %v454_v30, %v2094_v29  ;;  %v472_v36 = vsel %vm466_vm2, %v455_v31, %v2095_v28  ;;  %v2108_v37 = vpop.permute.xlu1 %2107 }
  0x96   : > { %v485_v38 = vpack.c.bf16 %v472_v36, %v471_v35  ;;  %v2103_v39 = vpop.permute.xlu0 %2102  ;;  %v2110_v40 = vunpack.i.h.bf16 %v2108_v37  ;;  %v2109_v41 = vunpack.i.l.bf16 %v2108_v37 }
  0x97   : > { %v2105_v44 = vunpack.i.h.bf16 %v2103_v39  ;;  %v2104_v45 = vunpack.i.l.bf16 %v2103_v39 }
  0x98   : > { %2014 = vmatprep.mubr.msk.bf16.mxu0 %vm498_vm3, %v485_v38  ;;  %v460_v52 = vsel %vm449_vm1, %v1870_v42, %v2109_v41  ;;  %v461_v53 = vsel %vm449_vm1, %v1871_v43, %v2110_v40 }
  0x99   : > { %2015 = vmatmul.mubr.msk.bf16.gmra.mxu0 %vm498_vm3, %v486_v34  ;;  %v2118_v48 = vpop.permute.xlu1 %2117  ;;  %v458_v56 = vsel %vm449_vm1, %v1868_v46, %v2104_v45  ;;  %v459_v57 = vsel %vm449_vm1, %v1869_v47, %v2105_v44 }
  0x9a   : > { %v2120_v49 = vunpack.i.h.bf16 %v2118_v48  ;;  %v2119_v50 = vunpack.i.l.bf16 %v2118_v48  ;;  %v2113_v51 = vpop.permute.xlu0 %2112 }
  0x9b   : > { %v2115_v54 = vunpack.i.h.bf16 %v2113_v51  ;;  %v2114_v55 = vunpack.i.l.bf16 %v2113_v51 }
  0x9c   : > { %v477_v58 = vsel %vm466_vm2, %v460_v52, %v2119_v50  ;;  %v478_v59 = vsel %vm466_vm2, %v461_v53, %v2120_v49 }
  0x9d   : > { %v488_v60 = vpack.c.bf16 %v478_v59, %v477_v58  ;;  %v475_v61 = vsel %vm466_vm2, %v458_v56, %v2114_v55  ;;  %v476_v62 = vsel %vm466_vm2, %v459_v57, %v2115_v54  ;;  %v2128_v63 = vpop.permute.xlu1 %2127 }
  0x9e   : > { %v487_v0 = vpack.c.bf16 %v476_v62, %v475_v61  ;;  %v2123_v1 = vpop.permute.xlu0 %2122  ;;  %v2130_v2 = vunpack.i.h.bf16 %v2128_v63  ;;  %v2129_v3 = vunpack.i.l.bf16 %v2128_v63 }
  0x9f   : > { %v2125_v6 = vunpack.i.h.bf16 %v2123_v1  ;;  %v2124_v7 = vunpack.i.l.bf16 %v2123_v1 }
  0xa0   : > { %2018 = vmatprep.mubr.msk.bf16.mxu0 %vm498_vm3, %v487_v0  ;;  %v464_v14 = vsel %vm449_vm1, %v1874_v4, %v2129_v3  ;;  %v465_v15 = vsel %vm449_vm1, %v1875_v5, %v2130_v2 }
  0xa1   : > { %2019 = vmatmul.mubr.msk.bf16.gmra.mxu0 %vm498_vm3, %v488_v60  ;;  %v2138_v10 = vpop.permute.xlu1 %2137  ;;  %v462_v18 = vsel %vm449_vm1, %v1872_v8, %v2124_v7  ;;  %v463_v19 = vsel %vm449_vm1, %v1873_v9, %v2125_v6 }
  0xa2   : > { %v2140_v11 = vunpack.i.h.bf16 %v2138_v10  ;;  %v2139_v12 = vunpack.i.l.bf16 %v2138_v10  ;;  %v2133_v13 = vpop.permute.xlu0 %2132 }
  0xa3   : > { %v2135_v16 = vunpack.i.h.bf16 %v2133_v13  ;;  %v2134_v17 = vunpack.i.l.bf16 %v2133_v13 }
  0xa4   : > { %v481_v20 = vsel %vm466_vm2, %v464_v14, %v2139_v12  ;;  %v482_v21 = vsel %vm466_vm2, %v465_v15, %v2140_v11 }
  0xa5   : > { %v490_v22 = vpack.c.bf16 %v482_v21, %v481_v20  ;;  %v479_v23 = vsel %vm466_vm2, %v462_v18, %v2134_v17  ;;  %v480_v24 = vsel %vm466_vm2, %v463_v19, %v2135_v16 }
  0xa6   : > { %v489_v25 = vpack.c.bf16 %v480_v24, %v479_v23 }
  0xa8   : > { %2022 = vmatprep.mubr.msk.bf16.mxu0 %vm498_vm3, %v489_v25 }
  0xa9   : > { %2023 = vmatmul.mubr.msk.bf16.gmra.mxu0 %vm498_vm3, %v490_v22 }
 0x151   : > { %v2012_v26 = vpop.f32.mrf.mxu0 }
 0x153   : > { %v561_v27 = vpop.f32.mrf.mxu0 }
 0x155   : > { %v2013_v28 = vpop.f32.mrf.mxu0 }
 0x157   : > { %v564_v29 = vpop.f32.mrf.mxu0 }
 0x158   : > { %v624_v30 = vadd.f32 %v564_v29, %v561_v27 }
 0x159   : > { %v2016_v31 = vpop.f32.mrf.mxu0 }
 0x15a   : > { %v625_v32 = vadd.f32 %v2012_v26, %v624_v30 }
 0x15b   : > { %v577_v33 = vpop.f32.mrf.mxu0 }
 0x15c   : > { %v626_v34 = vadd.f32 %v2013_v28, %v625_v32 }
 0x15d   : > { %v2017_v35 = vpop.f32.mrf.mxu0 }
 0x15e   : > { %v627_v36 = vadd.f32 %v626_v34, %v577_v33 }
 0x15f   : > { %v580_v37 = vpop.f32.mrf.mxu0 }
 0x160   : > { %v628_v38 = vadd.f32 %v627_v36, %v580_v37 }
 0x161   : > { %v2020_v39 = vpop.f32.mrf.mxu0 }
 0x162   : > { %v629_v40 = vadd.f32 %v2016_v31, %v628_v38 }
 0x163   : > { %v593_v41 = vpop.f32.mrf.mxu0 }
 0x164   : > { %v630_v42 = vadd.f32 %v2017_v35, %v629_v40 }
 0x165   : > { %v2021_v43 = vpop.f32.mrf.mxu0 }
 0x166   : > { %v631_v44 = vadd.f32 %v630_v42, %v593_v41 }
 0x167   : > { %v596_v45 = vpop.f32.mrf.mxu0 }
 0x168   : > { %v632_v46 = vadd.f32 %v631_v44, %v596_v45 }
 0x169   : > { %v2024_v47 = vpop.f32.mrf.mxu0 }
 0x16a   : > { %v633_v48 = vadd.f32 %v2020_v39, %v632_v46 }
 0x16b   : > { %v609_v49 = vpop.f32.mrf.mxu0 }
 0x16c   : > { %v634_v50 = vadd.f32 %v2021_v43, %v633_v48  ;;  %v2143_v48 = vld [vmem:[%s3112_s4 + $0xb8] sm:$0xff]  }
 0x16d   : > { %v2025_v51 = vpop.f32.mrf.mxu0  ;;  %2026 = vmatprep.subr.bf16.mxu0 %v2143_v48 }
 0x16e   : > { %v635_v52 = vadd.f32 %v634_v50, %v609_v49  ;;  %v639_v56 = vsel %vm638_vm4, %v2025_v51, 0.0  ;;  %v2144_v50 = vld [vmem:[%s3112_s4 + $0x38] sm:$0xff]   ;;  %2027 = vmatpush3.bf16.msra.mxu0 %v2143_v48 }
 0x16f   : > { %v612_v53 = vpop.f32.mrf.mxu0 }
 0x170   : > { %v636_v54 = vadd.f32 %v635_v52, %v612_v53 }
 0x172   : > { %v637_v55 = vadd.f32 %v2024_v47, %v636_v54  ;;  %v2146_v54 = vld [vmem:[%s3112_s4 + $0xb0] sm:$0xff]  }
 0x173   : > { %2028 = vmatprep.subr.bf16.mxu0 %v2146_v54 }
 0x174   : > { %v640_v57 = vadd.f32 %v639_v56, %v637_v55  ;;  %v2147_v55 = vld [vmem:[%s3112_s4 + $0x30] sm:$0xff]   ;;  %2029 = vmatpush3.bf16.msra.mxu0 %v2146_v54 }
 0x176   : > { %v641_v58 = vrot.slane %v640_v57, 4 }
 0x178   : > { %v642_v59 = vadd.f32 %v641_v58, %v640_v57  ;;  %v2148_v57 = vld [vmem:[%s3112_s4 + $0x68] sm:$0xff]  }
 0x179   : > { %v2149_v58 = vld [vmem:[%s3112_s4 + $0xa8] sm:$0xff]  }
 0x17a   : > { %v643_v60 = vrot.slane %v642_v59, 2  ;;  %2030 = vmatprep.subr.bf16.mxu0 %v2149_v58 }
 0x17b   : > { %2031 = vmatpush3.bf16.msra.mxu0 %v2149_v58 }
 0x17c   : > { %v644_v61 = vadd.f32 %v643_v60, %v642_v59  ;;  %v2150_v59 = vld [vmem:[%s3112_s4 + $0x28] sm:$0xff]  }
 0x17e   : > { %v645_v62 = vrot.slane %v644_v61, 1 }
 0x180   : > { %v646_v63 = vadd.f32 %v645_v62, %v644_v61  ;;  %v2151_v61 = vld [vmem:[%s3112_s4 + $0x60] sm:$0xff]  }
 0x181   : > { %v2152_v62 = vld [vmem:[%s3112_s4 + $0xa0] sm:$0xff]  }
 0x182   : > { %v648_v0 = vmul.f32 0.007874016, %v646_v63  ;;  %2032 = vmatprep.subr.bf16.mxu0 %v2152_v62 }
 0x183   : > { %2033 = vmatpush3.bf16.msra.mxu0 %v2152_v62 }
 0x184   : > { %v2428_v1 = vsub.f32 %v561_v27, %v648_v0  ;;  %v2430_v2 = vsub.f32 %v564_v29, %v648_v0  ;;  %v2432_v3 = vsub.f32 %v2012_v26, %v648_v0  ;;  %v2438_v6 = vsub.f32 %v2013_v28, %v648_v0 }
 0x185   : > { %v2440_v7 = vsub.f32 %v577_v33, %v648_v0  ;;  %v2444_v10 = vsub.f32 %v580_v37, %v648_v0  ;;  %v2448_v13 = vsub.f32 %v2016_v31, %v648_v0  ;;  %v2452_v16 = vsub.f32 %v2017_v35, %v648_v0 }
 0x186   : > { %v665_v4 = vmul.f32 %v2428_v1, %v2428_v1  ;;  %v666_v5 = vmul.f32 %v2430_v2, %v2430_v2  ;;  %v667_v8 = vmul.f32 %v2432_v3, %v2432_v3  ;;  %v668_v11 = vmul.f32 %v2438_v6, %v2438_v6 }
 0x187   : > { %v669_v14 = vmul.f32 %v2440_v7, %v2440_v7  ;;  %v670_v17 = vmul.f32 %v2444_v10, %v2444_v10  ;;  %v2456_v19 = vsub.f32 %v593_v41, %v648_v0  ;;  %v671_v20 = vmul.f32 %v2448_v13, %v2448_v13 }
 0x188   : > { %v681_v9 = vadd.f32 %v666_v5, %v665_v4  ;;  %v2460_v22 = vsub.f32 %v596_v45, %v648_v0  ;;  %v672_v23 = vmul.f32 %v2452_v16, %v2452_v16  ;;  %v2464_v25 = vsub.f32 %v2020_v39, %v648_v0  ;;  %v2154_v5 = vld [vmem:[%s3112_s4 + $0x58] sm:$0xff]  }
 0x189   : > { %v673_v26 = vmul.f32 %v2456_v19, %v2456_v19  ;;  %v2468_v28 = vsub.f32 %v2021_v43, %v648_v0  ;;  %v2472_v31 = vsub.f32 %v609_v49, %v648_v0  ;;  %v2476_v34 = vsub.f32 %v612_v53, %v648_v0  ;;  %v2145_v53 = vld [vmem:[%s3112_s4 + $0x70] sm:$0xff]  }
 0x18a   : > { %v682_v12 = vadd.f32 %v681_v9, %v667_v8  ;;  %v674_v29 = vmul.f32 %v2460_v22, %v2460_v22  ;;  %v675_v32 = vmul.f32 %v2464_v25, %v2464_v25  ;;  %v2480_v37 = vsub.f32 %v2025_v51, %v648_v0  ;;  %v2155_v8 = vld [vmem:[%s3112_s4 + $0x98] sm:$0xff]  }
 0x18b   : > { %v676_v35 = vmul.f32 %v2468_v28, %v2468_v28  ;;  %v2482_v38 = vsub.f32 %v2024_v47, %v648_v0  ;;  %v677_v39 = vmul.f32 %v2472_v31, %v2472_v31  ;;  %v678_v41 = vmul.f32 %v2476_v34, %v2476_v34  ;;  %v2142_v47 = vld [vmem:[%s3112_s4 + $0x78] sm:$0xff]   ;;  %v2153_v0 = vld [vmem:[%s3112_s4 + $0x20] sm:$0xff]   ;;  %2034 = vmatprep.subr.bf16.mxu0 %v2155_v8 }
 0x18c   : > { %v683_v15 = vadd.f32 %v682_v12, %v668_v11  ;;  %v680_v43 = vmul.f32 %v2480_v37, %v2480_v37  ;;  %1956 = vmatprep.subr.bf16.mxu1 %v2142_v47  ;;  %v2156_v11 = vld [vmem:[%s3112_s4 + $0x18] sm:$0xff]   ;;  %2035 = vmatpush3.bf16.msra.mxu0 %v2155_v8 }
 0x18d   : > { %v679_v44 = vmul.f32 %v2482_v38, %v2482_v38  ;;  %1957 = vmatpush3.bf16.msra.mxu1 %v2144_v50 }
 0x18e   : > { %v684_v18 = vadd.f32 %v683_v15, %v669_v14  ;;  %v695_v49 = vsel %vm638_vm4, %v680_v43, 0.0  ;;  %1958 = vmatprep.subr.bf16.mxu1 %v2145_v53  ;;  %v2157_v14 = vld [vmem:[%s3112_s4 + $0x50] sm:$0xff]  }
 0x18f   : > { %v2158_v15 = vld [vmem:[%s3112_s4 + $0x90] sm:$0xff]  }
 0x190   : > { %v685_v21 = vadd.f32 %v684_v18, %v670_v17  ;;  %v2159_v18 = vld [vmem:[%s3112_s4 + $0x10] sm:$0xff]   ;;  %2036 = vmatprep.subr.bf16.mxu0 %v2158_v15 }
 0x191   : > { %1959 = vmatpush3.bf16.msra.mxu1 %v2147_v55  ;;  %2037 = vmatpush3.bf16.msra.mxu0 %v2158_v15 }
 0x192   : > { %v686_v24 = vadd.f32 %v685_v21, %v671_v20  ;;  %1960 = vmatprep.subr.bf16.mxu1 %v2148_v57  ;;  %v2160_v20 = vld [vmem:[%s3112_s4 + $0x48] sm:$0xff]  }
 0x193   : > { %v2161_v21 = vld [vmem:[%s3112_s4 + $0x88] sm:$0xff]  }
 0x194   : > { %v687_v27 = vadd.f32 %v686_v24, %v672_v23  ;;  %v2162_v23 = vld [vmem:[%s3112_s4 + $0x8] sm:$0xff]   ;;  %2038 = vmatprep.subr.bf16.mxu0 %v2161_v21  ;;  %v2163_v24 = vld [vmem:[%s3112_s4 + $0x40] sm:$0xff]  }
 0x195   : > { %1961 = vmatpush3.bf16.msra.mxu1 %v2150_v59  ;;  %2039 = vmatpush3.bf16.msra.mxu0 %v2161_v21 }
 0x196   : > { %v688_v30 = vadd.f32 %v687_v27, %v673_v26  ;;  %1962 = vmatprep.subr.bf16.mxu1 %v2151_v61  ;;  %v2164_v26 = vld [vmem:[%s3112_s4 + $0x80] sm:$0xff]  }
 0x197   : > { %v2165_v27 = vld [vmem:[%s3112_s4] sm:$0xff]   ;;  %2040 = vmatprep.subr.bf16.mxu0 %v2164_v26 }
 0x198   : > { %v689_v33 = vadd.f32 %v688_v30, %v674_v29 }
 0x199   : > { %1963 = vmatpush3.bf16.msra.mxu1 %v2153_v0  ;;  %2041 = vmatpush3.bf16.msra.mxu0 %v2164_v26 }
 0x19a   : > { %v690_v36 = vadd.f32 %v689_v33, %v675_v32  ;;  %1964 = vmatprep.subr.bf16.mxu1 %v2154_v5 }
 0x19c   : > { %v691_v40 = vadd.f32 %v690_v36, %v676_v35 }
 0x19d   : > { %1965 = vmatpush3.bf16.msra.mxu1 %v2156_v11 }
 0x19e   : > { %v692_v42 = vadd.f32 %v691_v40, %v677_v39  ;;  %1966 = vmatprep.subr.bf16.mxu1 %v2157_v14  ;;  %v2579_v39 = vld [vmem:[%s3110_s2] ss:$0 sm:$0xff] }
 0x1a0   : > { %v693_v45 = vadd.f32 %v692_v42, %v678_v41 }
 0x1a1   : > { %1967 = vmatpush3.bf16.msra.mxu1 %v2159_v18 }
 0x1a2   : > { %v694_v46 = vadd.f32 %v693_v45, %v679_v44  ;;  %1968 = vmatprep.subr.bf16.mxu1 %v2160_v20 }
 0x1a4   : > { %v696_v51 = vadd.f32 %v695_v49, %v694_v46 }
 0x1a5   : > { %1969 = vmatpush3.bf16.msra.mxu1 %v2162_v23 }
 0x1a6   : > { %v697_v52 = vrot.slane %v696_v51, 4  ;;  %1970 = vmatprep.subr.bf16.mxu1 %v2163_v24 }
 0x1a8   : > { %v698_v56 = vadd.f32 %v697_v52, %v696_v51 }
 0x1a9   : > { %1971 = vmatpush3.bf16.msra.mxu1 %v2165_v27 }
 0x1aa   : > { %v699_v60 = vrot.slane %v698_v56, 2 }
 0x1ac   : > { %v700_v63 = vadd.f32 %v699_v60, %v698_v56 }
 0x1ae   : > { %v701_v4 = vrot.slane %v700_v63, 1 }
 0x1b0   : > { %v702_v9 = vadd.f32 %v701_v4, %v700_v63 }
 0x1b2   : > { %v703_v12 = vmul.f32 0.007874016, %v702_v9 }
 0x1b4   : > { %v704_v17 = vadd.f32 1e-05, %v703_v12 }
 0x1b6   : > { %2166 = vrsqrt.f32 %v704_v17 }
 0x1c3   : > { %v2167_v29 = vpop.eup %2166 }
 0x1c4   : > { %v2566_v30 = vmul.f32 %v2167_v29, %v2428_v1  ;;  %v2569_v32 = vmul.f32 %v2167_v29, %v2430_v2  ;;  %v2572_v33 = vmul.f32 %v2167_v29, %v2432_v3  ;;  %v709_v35 = vmul.f32 %v2167_v29, %v2438_v6 }
 0x1c5   : > { %v711_v36 = vmul.f32 %v2167_v29, %v2444_v10  ;;  %v712_v40 = vmul.f32 %v2167_v29, %v2448_v13  ;;  %v713_v1 = vmul.f32 %v2167_v29, %v2452_v16  ;;  %v714_v41 = vmul.f32 %v2167_v29, %v2456_v19  ;;  %v2594_v13 = vld [vmem:[%s3111_s3] ss:$0 sm:$0xff] }
 0x1c6   : > { %v715_v2 = vmul.f32 %v2167_v29, %v2460_v22  ;;  %v716_v3 = vmul.f32 %v2167_v29, %v2464_v25  ;;  %v732_v42 = vmul.f32 %v2579_v39, %v709_v35  ;;  %v710_v6 = vmul.f32 %v2167_v29, %v2440_v7 }
 0x1c7   : > { %v717_v10 = vmul.f32 %v2167_v29, %v2468_v28  ;;  %v718_v43 = vmul.f32 %v2167_v29, %v2472_v31  ;;  %v734_v44 = vmul.f32 %v2579_v39, %v711_v36  ;;  %v719_v16 = vmul.f32 %v2167_v29, %v2476_v34 }
 0x1c8   : > { %v720_v19 = vmul.f32 %v2167_v29, %v2482_v38  ;;  %v735_v22 = vmul.f32 %v2579_v39, %v712_v40  ;;  %v736_v25 = vmul.f32 %v2579_v39, %v713_v1  ;;  %v737_v7 = vmul.f32 %v2579_v39, %v714_v41 }
 0x1c9   : > { %v721_v28 = vmul.f32 %v2167_v29, %v2480_v37  ;;  %v738_v31 = vmul.f32 %v2579_v39, %v715_v2  ;;  %v739_v45 = vmul.f32 %v2579_v39, %v716_v3  ;;  %v2605_v46 = vadd.f32 %v2594_v13, %v732_v42 }
 0x1ca   : > { %v733_v47 = vmul.f32 %v2579_v39, %v710_v6  ;;  %v740_v34 = vmul.f32 %v2579_v39, %v717_v10  ;;  %v741_v38 = vmul.f32 %v2579_v39, %v718_v43  ;;  %v757_v48 = vadd.f32 %v2594_v13, %v734_v44 }
 0x1cb   : > { %3129 = vst [vmem:[#allocation3_spill] sm:$0xff] %v2605_v46  ;;  %v742_v49 = vmul.f32 %v2579_v39, %v719_v16  ;;  %v743_v50 = vmul.f32 %v2579_v39, %v720_v19  ;;  %v758_v37 = vadd.f32 %v2594_v13, %v735_v22  ;;  %v759_v51 = vadd.f32 %v2594_v13, %v736_v25 }
 0x1cc   : > { %v760_v52 = vadd.f32 %v2594_v13, %v737_v7  ;;  %v744_v53 = vmul.f32 %v2579_v39, %v721_v28  ;;  %v761_v54 = vadd.f32 %v2594_v13, %v738_v31  ;;  %v762_v55 = vadd.f32 %v2594_v13, %v739_v45 }
 0x1cd   : > { %v2620_v56 = vmul.f32 0.70710677, %v2605_v46  ;;  %v2623_v57 = vadd.f32 %v2594_v13, %v733_v47  ;;  %v763_v58 = vadd.f32 %v2594_v13, %v740_v34  ;;  %v764_v59 = vadd.f32 %v2594_v13, %v741_v38 }
 0x1ce   : > { %v2627_v60 = vmul.f32 0.70710677, %v757_v48  ;;  %v765_v61 = vadd.f32 %v2594_v13, %v742_v49  ;;  %v766_v62 = vadd.f32 %v2594_v13, %v743_v50  ;;  %v2631_v63 = vmul.f32 0.5, %v757_v48 }
 0x1cf   : > { %3130 = vst [vmem:[#allocation4_spill] sm:$0xff] %v2620_v56  ;;  %3131 = vst [vmem:[#allocation5_spill] sm:$0xff] %v2623_v57  ;;  %v2633_v0 = vmul.f32 0.70710677, %v758_v37  ;;  %v2635_v4 = vmul.f32 0.5, %v758_v37  ;;  %v2637_v5 = vmul.f32 0.5, %v759_v51  ;;  %v2662_v23 = vadd.f32 %v2594_v13, %v744_v53 }
 0x1d0   : > { %v2639_v8 = vmul.f32 0.5, %v760_v52  ;;  %v2641_v9 = vmul.f32 0.70710677, %v759_v51  ;;  %v2643_v11 = vmul.f32 0.5, %v761_v54  ;;  %v2645_v12 = vmul.f32 0.5, %v762_v55 }
 0x1d1   : > { %v2647_v14 = vmul.f32 0.70710677, %v760_v52  ;;  %v2650_v15 = vand.u32 2147483647, %v2620_v56  ;;  %v2652_v17 = vmul.f32 0.5, %v763_v58  ;;  %v2654_v18 = vmul.f32 0.5, %v764_v59 }
 0x1d2   : > { %v2656_v20 = vmul.f32 0.70710677, %v761_v54  ;;  %v2659_v21 = vand.u32 2147483647, %v2627_v60  ;;  %3133 = vst [vmem:[#allocation7_spill] sm:$0xff] %v2662_v23  ;;  %v729_v2 = vmul.f32 %v2579_v39, %v2566_v30  ;;  %v730_v10 = vmul.f32 %v2579_v39, %v2569_v32 }
 0x1d3   : > { %3132 = vst [vmem:[#allocation6_spill] sm:$0xff] %v2654_v18  ;;  %v2665_v24 = vmul.f32 0.70710677, %v2623_v57  ;;  %v2667_v26 = vmul.f32 0.70710677, %v762_v55  ;;  %v2704_v30 = vmul.f32 %v2579_v39, %v2572_v33  ;;  %v2713_v25 = vmul.f32 0.5, %v765_v61 }
 0x1d4   : > { %v2670_v27 = vand.u32 2147483647, %v2633_v0  ;;  %v2672_v29 = vmul.f32 0.70710677, %v763_v58  ;;  %v2674_v35 = vmul.f32 0.70710677, %v764_v59  ;;  %v2730_v49 = vadd.f32 %v2594_v13, %v729_v2 }
 0x1d5   : > { %3134 = vst [vmem:[#allocation8_spill] sm:$0xff] %v2665_v24  ;;  %v2677_v36 = vand.u32 2147483647, %v2641_v9  ;;  %v2679_v40 = vmul.f32 0.70710677, %v765_v61  ;;  %3139 = vst [vmem:[#allocation13_spill] sm:$0xff] %v2713_v25  ;;  %v2737_v52 = vadd.f32 %v2594_v13, %v730_v10 }
 0x1d6   : > { %v2682_v1 = vand.u32 2147483647, %v2647_v14  ;;  %v819_v41 = vmul.f32 0.3275911, %v2650_v15  ;;  %v2687_v3 = vmul.f32 0.70710677, %v766_v62 }
 0x1d7   : > { %3135 = vst [vmem:[#allocation9_spill] sm:$0xff] %v2679_v40  ;;  %v2690_v42 = vand.u32 2147483647, %v2656_v20  ;;  %v821_v6 = vmul.f32 0.3275911, %v2659_v21  ;;  %v2719_v45 = vmul.f32 0.5, %v766_v62 }
 0x1d8   : > { %3136 = vst [vmem:[#allocation10_spill] sm:$0xff] %v2687_v3  ;;  %v2696_v43 = vmul.f32 0.70710677, %v2662_v23  ;;  %v2699_v44 = vand.u32 2147483647, %v2667_v26  ;;  %v835_v31 = vadd.f32 1.0, %v819_v41 }
 0x1d9   : > { %v822_v16 = vmul.f32 0.3275911, %v2670_v27  ;;  %v2707_v19 = vand.u32 2147483647, %v2665_v24  ;;  %v2710_v22 = vand.u32 2147483647, %v2672_v29 }
 0x1da   : > { %3137 = vst [vmem:[#allocation11_spill] sm:$0xff] %v2696_v43  ;;  %v823_v32 = vmul.f32 0.3275911, %v2677_v36  ;;  %v2716_v7 = vand.u32 2147483647, %v2674_v35  ;;  %3140 = vst [vmem:[#allocation14_spill] sm:$0xff] %v2719_v45  ;;  %2168 = vrcp.f32 %v835_v31 }
 0x1db   : > { %3138 = vst [vmem:[#allocation12_spill] sm:$0xff] %v2707_v19  ;;  %v824_v28 = vmul.f32 0.3275911, %v2682_v1  ;;  %v2722_v33 = vand.u32 2147483647, %v2679_v40  ;;  %v837_v47 = vadd.f32 1.0, %v821_v6 }
 0x1dc   : > { %v825_v39 = vmul.f32 0.3275911, %v2690_v42  ;;  %v2726_v34 = vand.u32 2147483647, %v2687_v3  ;;  %v826_v38 = vmul.f32 0.3275911, %v2699_v44 }
 0x1dd   : > { %v838_v48 = vadd.f32 1.0, %v822_v16  ;;  %v2733_v50 = vand.u32 2147483647, %v2696_v43  ;;  %v827_v37 = vmul.f32 0.3275911, %v2710_v22  ;;  %v839_v51 = vadd.f32 1.0, %v823_v32 }
 0x1de   : > { %v820_v53 = vmul.f32 0.3275911, %v2707_v19  ;;  %v828_v54 = vmul.f32 0.3275911, %v2716_v7  ;;  %v840_v55 = vadd.f32 1.0, %v824_v28  ;;  %v841_v59 = vadd.f32 1.0, %v825_v39 }
 0x1df   : > { %v829_v58 = vmul.f32 0.3275911, %v2722_v33  ;;  %2170 = vrcp.f32 %v837_v47  ;;  %v1011_v61 = vsub.f32 0.0, %v2650_v15  ;;  %v830_v62 = vmul.f32 0.3275911, %v2726_v34 }
 0x1e0   : > { %v842_v41 = vadd.f32 1.0, %v826_v38  ;;  %2172 = vrcp.f32 %v838_v48  ;;  %v1013_v2 = vsub.f32 0.0, %v2659_v21  ;;  %v831_v6 = vmul.f32 0.3275911, %v2733_v50 }
 0x1e1   : > { %v843_v10 = vadd.f32 1.0, %v827_v37  ;;  %2174 = vrcp.f32 %v839_v51  ;;  %v1014_v16 = vsub.f32 0.0, %v2670_v27  ;;  %v836_v32 = vadd.f32 1.0, %v820_v53 }
 0x1e2   : > { %v844_v28 = vadd.f32 1.0, %v828_v54  ;;  %2176 = vrcp.f32 %v840_v55  ;;  %v1015_v31 = vsub.f32 0.0, %v2677_v36  ;;  %v845_v39 = vadd.f32 1.0, %v829_v58 }
 0x1e3   : > { %2178 = vrcp.f32 %v841_v59  ;;  %v1016_v47 = vsub.f32 0.0, %v2682_v1  ;;  %v1027_v38 = vmul.f32 %v1011_v61, %v2650_v15  ;;  %v846_v48 = vadd.f32 1.0, %v830_v62 }
 0x1e4   : > { %2180 = vrcp.f32 %v842_v41  ;;  %v1017_v57 = vsub.f32 0.0, %v2690_v42  ;;  %v1029_v37 = vmul.f32 %v1013_v2, %v2659_v21  ;;  %v847_v51 = vadd.f32 1.0, %v831_v6 }
 0x1e5   : > { %2182 = vrcp.f32 %v843_v10  ;;  %v1018_v53 = vsub.f32 0.0, %v2699_v44  ;;  %v1030_v54 = vmul.f32 %v1014_v16, %v2670_v27  ;;  %v1019_v55 = vsub.f32 0.0, %v2710_v22 }
 0x1e6   : > { %2184 = vrcp.f32 %v844_v28  ;;  %v1020_v58 = vsub.f32 0.0, %v2716_v7  ;;  %v1031_v59 = vmul.f32 %v1015_v31, %v2677_v36  ;;  %v1021_v15 = vsub.f32 0.0, %v2722_v33 }
 0x1e7   : > { %2186 = vrcp.f32 %v845_v39  ;;  %v1032_v61 = vmul.f32 %v1016_v47, %v2682_v1  ;;  %v1046_v62 = vmul.f32 1.442695, %v1027_v38  ;;  %v1022_v21 = vsub.f32 0.0, %v2726_v34  ;;  %v2765_v1 = vpop.eup %2168 }
 0x1e8   : > { %2188 = vrcp.f32 %v846_v48  ;;  %v1033_v41 = vmul.f32 %v1017_v57, %v2690_v42  ;;  %v1050_v2 = vmul.f32 1.442695, %v1029_v37  ;;  %v1023_v27 = vsub.f32 0.0, %v2733_v50  ;;  %3141 = vst [vmem:[#allocation15_spill] sm:$0xff] %v2765_v1 }
 0x1e9   : > { %2190 = vrcp.f32 %v847_v51  ;;  %v1034_v6 = vmul.f32 %v1018_v53, %v2699_v44  ;;  %v1052_v10 = vmul.f32 1.442695, %v1030_v54  ;;  %v1035_v36 = vmul.f32 %v1019_v55, %v2710_v22 }
 0x1ea   : > { %2192 = vrcp.f32 %v836_v32  ;;  %v1036_v16 = vmul.f32 %v1020_v58, %v2716_v7  ;;  %v1054_v28 = vmul.f32 1.442695, %v1031_v59  ;;  %v1037_v31 = vmul.f32 %v1021_v15, %v2722_v33 }
 0x1eb   : > { %2194 = vpow2.f32 %v1046_v62  ;;  %v1056_v39 = vmul.f32 1.442695, %v1032_v61  ;;  %v2770_v57 = vadd.f32 %v2594_v13, %v2704_v30  ;;  %v1038_v32 = vmul.f32 %v1022_v21, %v2726_v34 }
 0x1ec   : > { %v2772_v42 = vpop.eup %2170  ;;  %2196 = vpow2.f32 %v1050_v2  ;;  %v1058_v22 = vmul.f32 1.442695, %v1033_v41  ;;  %v2780_v33 = vmul.f32 %v1023_v27, %v2733_v50  ;;  %v1060_v38 = vmul.f32 1.442695, %v1034_v6 }
 0x1ed   : > { %3142 = vst [vmem:[#allocation16_spill] sm:$0xff] %v2770_v57  ;;  %v2776_v7 = vpop.eup %2172  ;;  %v869_v47 = vmul.f32 1.0614054, %v2772_v42  ;;  %2198 = vpow2.f32 %v1052_v10  ;;  %v1062_v30 = vmul.f32 1.442695, %v1035_v36  ;;  %vm1109_vm5 = vcmp.lt.f32.partialorder %v2627_v60, 0.0 }
 0x1ee   : > { %v2782_v48 = vpop.eup %2174  ;;  %v870_v13 = vmul.f32 1.0614054, %v2776_v7  ;;  %2200 = vpow2.f32 %v1054_v28  ;;  %v2785_v37 = vmul.f32 1.442695, %v1036_v16  ;;  %v2790_v54 = vmul.f32 1.442695, %v1037_v31 }
 0x1ef   : > { %v2787_v34 = vpop.eup %2176  ;;  %v871_v51 = vmul.f32 1.0614054, %v2782_v48  ;;  %v885_v53 = vadd.f32 -1.4531521, %v869_v47  ;;  %2202 = vpow2.f32 %v1056_v39  ;;  %v2795_v59 = vmul.f32 1.442695, %v1038_v32 }
 0x1f0   : > { %v2792_v50 = vpop.eup %2178  ;;  %v872_v55 = vmul.f32 1.0614054, %v2787_v34  ;;  %v886_v58 = vadd.f32 -1.4531521, %v870_v13  ;;  %2204 = vpow2.f32 %v1058_v22  ;;  %vm1110_vm6 = vcmp.lt.f32.partialorder %v2633_v0, 0.0 }
 0x1f1   : > { %v2797_v15 = vpop.eup %2180  ;;  %v873_v61 = vmul.f32 1.0614054, %v2792_v50  ;;  %v887_v62 = vadd.f32 -1.4531521, %v871_v51  ;;  %v901_v21 = vmul.f32 %v2772_v42, %v885_v53  ;;  %2206 = vpow2.f32 %v1060_v38 }
 0x1f2   : > { %v2801_v41 = vpop.eup %2182  ;;  %v874_v2 = vmul.f32 1.0614054, %v2797_v15  ;;  %v888_v27 = vadd.f32 -1.4531521, %v872_v55  ;;  %v902_v6 = vmul.f32 %v2776_v7, %v886_v58  ;;  %2208 = vpow2.f32 %v1062_v30 }
 0x1f3   : > { %v2805_v10 = vpop.eup %2184  ;;  %v875_v36 = vmul.f32 1.0614054, %v2801_v41  ;;  %v889_v16 = vadd.f32 -1.4531521, %v873_v61  ;;  %v903_v28 = vmul.f32 %v2782_v48, %v887_v62  ;;  %v917_v31 = vadd.f32 1.4214138, %v901_v21 }
 0x1f4   : > { %v2809_v39 = vpop.eup %2186  ;;  %v876_v32 = vmul.f32 1.0614054, %v2805_v10  ;;  %v890_v22 = vadd.f32 -1.4531521, %v874_v2  ;;  %v904_v47 = vmul.f32 %v2787_v34, %v888_v27  ;;  %v918_v38 = vadd.f32 1.4214138, %v902_v6 }
 0x1f5   : > { %v2813_v13 = vpop.eup %2188  ;;  %v877_v30 = vmul.f32 1.0614054, %v2809_v39  ;;  %v891_v51 = vadd.f32 -1.4531521, %v875_v36  ;;  %v905_v53 = vmul.f32 %v2792_v50, %v889_v16  ;;  %v919_v55 = vadd.f32 1.4214138, %v903_v28 }
 0x1f6   : > { %v2817_v58 = vpop.eup %2190  ;;  %v878_v61 = vmul.f32 1.0614054, %v2813_v13  ;;  %v892_v62 = vadd.f32 -1.4531521, %v876_v32  ;;  %v906_v21 = vmul.f32 %v2797_v15, %v890_v22  ;;  %v920_v44 = vadd.f32 1.4214138, %v904_v47 }
 0x1f7   : > { %v2821_v2 = vpop.eup %2192  ;;  %v879_v27 = vmul.f32 1.0614054, %v2817_v58  ;;  %v893_v6 = vadd.f32 -1.4531521, %v877_v30  ;;  %v907_v24 = vmul.f32 %v2801_v41, %v891_v51  ;;  %v921_v46 = vadd.f32 1.4214138, %v905_v53 }
 0x1f8   : > { %3143 = vst [vmem:[#allocation17_spill] sm:$0xff] %v2821_v2  ;;  %v2825_v36 = vpop.eup %2194  ;;  %v894_v16 = vadd.f32 -1.4531521, %v878_v61  ;;  %v908_v28 = vmul.f32 %v2805_v10, %v892_v62  ;;  %v922_v56 = vadd.f32 1.4214138, %v906_v21  ;;  %v933_v45 = vmul.f32 %v2772_v42, %v917_v31 }
 0x1f9   : > { %3144 = vst [vmem:[#allocation18_spill] sm:$0xff] %v2825_v36  ;;  %v2829_v32 = vpop.eup %2196  ;;  %v895_v22 = vadd.f32 -1.4531521, %v879_v27  ;;  %v909_v47 = vmul.f32 %v2809_v39, %v893_v6  ;;  %v923_v2 = vadd.f32 1.4214138, %v907_v24  ;;  %v934_v25 = vmul.f32 %v2776_v7, %v918_v38 }
 0x1fa   : > { %v2833_v30 = vpop.eup %2198  ;;  %v910_v51 = vmul.f32 %v2813_v13, %v894_v16  ;;  %v924_v53 = vadd.f32 1.4214138, %v908_v28  ;;  %v935_v61 = vmul.f32 %v2782_v48, %v919_v55  ;;  %v936_v62 = vmul.f32 %v2787_v34, %v920_v44 }
 0x1fb   : > { %v2838_v21 = vpop.eup %2200  ;;  %v911_v31 = vmul.f32 %v2817_v58, %v895_v22  ;;  %v925_v36 = vadd.f32 1.4214138, %v909_v47  ;;  %v937_v27 = vmul.f32 %v2792_v50, %v921_v46  ;;  %v938_v24 = vmul.f32 %v2797_v15, %v922_v56 }
 0x1fc   : > { %v2843_v6 = vpop.eup %2202  ;;  %v926_v38 = vadd.f32 1.4214138, %v910_v51  ;;  %v939_v23 = vmul.f32 %v2801_v41, %v923_v2  ;;  %v940_v16 = vmul.f32 %v2805_v10, %v924_v53  ;;  %v949_v28 = vadd.f32 -0.28449672, %v933_v45 }
 0x1fd   : > { %v2205_v55 = vpop.eup %2204  ;;  %v927_v19 = vadd.f32 1.4214138, %v911_v31  ;;  %v941_v44 = vmul.f32 %v2809_v39, %v925_v36  ;;  %v950_v43 = vadd.f32 -0.28449672, %v934_v25  ;;  %v951_v18 = vadd.f32 -0.28449672, %v935_v61 }
 0x1fe   : > { %v2207_v22 = vpop.eup %2206  ;;  %v942_v47 = vmul.f32 %v2813_v13, %v926_v38  ;;  %v952_v46 = vadd.f32 -0.28449672, %v936_v62  ;;  %v953_v3 = vadd.f32 -0.28449672, %v937_v27  ;;  %v954_v56 = vadd.f32 -0.28449672, %v938_v24 }
 0x1ff   : > { %v2209_v1 = vpop.eup %2208  ;;  %v943_v51 = vmul.f32 %v2817_v58, %v927_v19  ;;  %v955_v57 = vadd.f32 -0.28449672, %v939_v23  ;;  %v956_v2 = vadd.f32 -0.28449672, %v940_v16  ;;  %v957_v40 = vadd.f32 -0.28449672, %v941_v44 }
 0x200   : > { %v958_v53 = vadd.f32 -0.28449672, %v942_v47  ;;  %v965_v45 = vmul.f32 %v2772_v42, %v949_v28  ;;  %v966_v31 = vmul.f32 %v2776_v7, %v950_v43  ;;  %v967_v25 = vmul.f32 %v2782_v48, %v951_v18 }
 0x201   : > { %v959_v36 = vadd.f32 -0.28449672, %v943_v51  ;;  %v968_v61 = vmul.f32 %v2787_v34, %v952_v46  ;;  %v969_v62 = vmul.f32 %v2792_v50, %v953_v3  ;;  %v970_v27 = vmul.f32 %v2797_v15, %v954_v56 }
 0x202   : > { %v971_v24 = vmul.f32 %v2801_v41, %v955_v57  ;;  %v972_v23 = vmul.f32 %v2805_v10, %v956_v2  ;;  %v973_v19 = vmul.f32 %v2809_v39, %v957_v40  ;;  %v974_v38 = vmul.f32 %v2813_v13, %v958_v53 }
 0x203   : > { %v975_v16 = vmul.f32 %v2817_v58, %v959_v36  ;;  %v981_v43 = vadd.f32 0.2548296, %v965_v45  ;;  %v982_v28 = vadd.f32 0.2548296, %v966_v31  ;;  %v983_v18 = vadd.f32 0.2548296, %v967_v25 }
 0x204   : > { %v984_v44 = vadd.f32 0.2548296, %v968_v61  ;;  %v985_v47 = vadd.f32 0.2548296, %v969_v62  ;;  %v986_v46 = vadd.f32 0.2548296, %v970_v27  ;;  %2210 = vpow2.f32 %v2785_v37 }
 0x205   : > { %v987_v3 = vadd.f32 0.2548296, %v971_v24  ;;  %v988_v56 = vadd.f32 0.2548296, %v972_v23  ;;  %v997_v57 = vmul.f32 %v2772_v42, %v981_v43  ;;  %v1070_v51 = vmul.f32 1.442695, %v2780_v33 }
 0x206   : > { %v998_v40 = vmul.f32 %v2776_v7, %v982_v28  ;;  %v999_v2 = vmul.f32 %v2782_v48, %v983_v18  ;;  %v1000_v53 = vmul.f32 %v2787_v34, %v984_v44  ;;  %v1001_v45 = vmul.f32 %v2792_v50, %v985_v47 }
 0x207   : > { %v1002_v37 = vmul.f32 %v2797_v15, %v986_v46  ;;  %v1003_v31 = vmul.f32 %v2801_v41, %v987_v3  ;;  %vm1111_vm7 = vcmp.lt.f32.partialorder %v2641_v9, 0.0  ;;  %vm1112_vm8 = vcmp.lt.f32.partialorder %v2647_v14, 0.0 }
 0x208   : > { %vm1113_vm9 = vcmp.lt.f32.partialorder %v2656_v20, 0.0  ;;  %vm1114_vm10 = vcmp.lt.f32.partialorder %v2667_v26, 0.0  ;;  %v989_v42 = vadd.f32 0.2548296, %v973_v19  ;;  %v990_v7 = vadd.f32 0.2548296, %v974_v38 }
 0x209   : > { %v991_v33 = vadd.f32 0.2548296, %v975_v16  ;;  %v1004_v48 = vmul.f32 %v2805_v10, %v988_v56  ;;  %vm1115_vm11 = vcmp.lt.f32.partialorder %v2672_v29, 0.0  ;;  %2212 = vpow2.f32 %v2790_v54 }
 0x20a   : > { %v1077_v34 = vmul.f32 %v2829_v32, %v997_v57  ;;  %v1078_v50 = vmul.f32 %v2833_v30, %v998_v40  ;;  %v1079_v15 = vmul.f32 %v2838_v21, %v999_v2  ;;  %2214 = vpow2.f32 %v2795_v59 }
 0x20b   : > { %v1080_v41 = vmul.f32 %v2843_v6, %v1000_v53  ;;  %v1081_v25 = vmul.f32 %v2205_v55, %v1001_v45  ;;  %v1082_v36 = vmul.f32 %v2207_v22, %v1002_v37  ;;  %2216 = vpow2.f32 %v1070_v51 }
 0x20c   : > { %v1083_v61 = vmul.f32 %v2209_v1, %v1003_v31  ;;  %v1093_v62 = vsub.f32 1.0, %v1077_v34  ;;  %v1094_v10 = vsub.f32 1.0, %v1078_v50  ;;  %v1095_v27 = vsub.f32 1.0, %v1079_v15  ;;  %v3145_v31 = vld [vmem:[#allocation9_spill] sm:$0xff] }
 0x20d   : > { %v1096_v24 = vsub.f32 1.0, %v1080_v41  ;;  %v1097_v23 = vsub.f32 1.0, %v1081_v25  ;;  %v1098_v54 = vsub.f32 1.0, %v1082_v36  ;;  %v1005_v32 = vmul.f32 %v2809_v39, %v989_v42 }
 0x20e   : > { %v1099_v19 = vsub.f32 1.0, %v1083_v61  ;;  %v1125_v30 = vsub.f32 0.0, %v1093_v62  ;;  %v1126_v38 = vsub.f32 0.0, %v1094_v10  ;;  %v1127_v21 = vsub.f32 0.0, %v1095_v27 }
 0x20f   : > { %v1128_v16 = vsub.f32 0.0, %v1096_v24  ;;  %v1129_v59 = vsub.f32 0.0, %v1097_v23  ;;  %v1130_v43 = vsub.f32 0.0, %v1098_v54  ;;  %v1006_v6 = vmul.f32 %v2813_v13, %v990_v7 }
 0x210   : > { %vm1116_vm12 = vcmp.lt.f32.partialorder %v2674_v35, 0.0  ;;  %v1131_v1 = vsub.f32 0.0, %v1099_v19  ;;  %v1141_v55 = vsel %vm1109_vm5, %v1125_v30, %v1093_v62  ;;  %v1142_v22 = vsel %vm1110_vm6, %v1126_v38, %v1094_v10  ;;  %v3149_v38 = vld [vmem:[#allocation6_spill] sm:$0xff] }
 0x211   : > { %v1143_v39 = vsel %vm1111_vm7, %v1127_v21, %v1095_v27  ;;  %v1144_v28 = vsel %vm1112_vm8, %v1128_v16, %v1096_v24  ;;  %v1145_v18 = vsel %vm1113_vm9, %v1129_v59, %v1097_v23  ;;  %v1146_v13 = vsel %vm1114_vm10, %v1130_v43, %v1098_v54  ;;  %v2211_v44 = vpop.eup %2210 }
 0x212   : > { %v1147_v60 = vsel %vm1115_vm11, %v1131_v1, %v1099_v19  ;;  %v1157_v47 = vadd.f32 1.0, %v1141_v55  ;;  %v1158_v46 = vadd.f32 1.0, %v1142_v22  ;;  %v1159_v0 = vadd.f32 1.0, %v1143_v39  ;;  %v3150_v1 = vld [vmem:[#allocation11_spill] sm:$0xff] }
 0x213   : > { %v1084_v3 = vmul.f32 %v2211_v44, %v1004_v48  ;;  %v1160_v56 = vadd.f32 1.0, %v1144_v28  ;;  %v1161_v9 = vadd.f32 1.0, %v1145_v18  ;;  %v1162_v57 = vadd.f32 1.0, %v1146_v13  ;;  %v3151_v13 = vld [vmem:[#allocation12_spill] sm:$0xff] }
 0x214   : > { %v1163_v51 = vadd.f32 1.0, %v1147_v60  ;;  %v1173_v14 = vmul.f32 %v1157_v47, %v2631_v63  ;;  %v1174_v20 = vmul.f32 %v1158_v46, %v2635_v4  ;;  %v1175_v40 = vmul.f32 %v1159_v0, %v2637_v5  ;;  %v3153_v0 = vld [vmem:[#allocation7_spill] sm:$0xff] }
 0x215   : > { %v1100_v26 = vsub.f32 1.0, %v1084_v3  ;;  %v1176_v2 = vmul.f32 %v1160_v56, %v2639_v8  ;;  %v1177_v29 = vmul.f32 %v1161_v9, %v2643_v11  ;;  %v1178_v53 = vmul.f32 %v1162_v57, %v2645_v12  ;;  %v3146_v11 = vld [vmem:[#allocation16_spill] sm:$0xff]  ;;  %v3154_v9 = vld [vmem:[#allocation13_spill] sm:$0xff] }
 0x216   : > { %v1007_v45 = vmul.f32 %v2817_v58, %v991_v33  ;;  %v1179_v37 = vmul.f32 %v1163_v51, %v2652_v17  ;;  %1189 = vst [vmem:[#allocation2 + $0x28] sm:$0xff] %v1173_v14  ;;  %1190 = vst [vmem:[#allocation2 + $0x30] sm:$0xff] %v1174_v20  ;;  %v2910_v63 = vmul.f32 0.70710677, %v2730_v49  ;;  %v2913_v4 = vmul.f32 0.70710677, %v2737_v52  ;;  %v2213_v5 = vpop.eup %2212 }
 0x217   : > { %1191 = vst [vmem:[#allocation2 + $0x38] sm:$0xff] %v1175_v40  ;;  %vm1117_vm13 = vcmp.lt.f32.partialorder %v3145_v31, 0.0  ;;  %v1132_v8 = vsub.f32 0.0, %v1100_v26  ;;  %1192 = vst [vmem:[#allocation2 + $0x40] sm:$0xff] %v1176_v2  ;;  %v2917_v12 = vmul.f32 0.70710677, %v3146_v11  ;;  %v2215_v42 = vpop.eup %2214  ;;  %v1085_v7 = vmul.f32 %v2213_v5, %v1005_v32 }
 0x218   : > { %1193 = vst [vmem:[#allocation2 + $0x48] sm:$0xff] %v1177_v29  ;;  %1194 = vst [vmem:[#allocation2 + $0x50] sm:$0xff] %v1178_v53  ;;  %v3147_v17 = vld [vmem:[#allocation15_spill] sm:$0xff]  ;;  %v3148_v33 = vld [vmem:[#allocation10_spill] sm:$0xff]  ;;  %v800_v48 = vand.u32 2147483647, %v2910_v63  ;;  %v2217_v50 = vpop.eup %2216  ;;  %v1086_v15 = vmul.f32 %v2215_v42, %v1006_v6 }
 0x219   : > { %v867_v58 = vmul.f32 1.0614054, %v3147_v17  ;;  %vm1118_vm14 = vcmp.lt.f32.partialorder %v3148_v33, 0.0  ;;  %1195 = vst [vmem:[#allocation2 + $0x58] sm:$0xff] %v1179_v37  ;;  %v801_v34 = vand.u32 2147483647, %v2913_v4  ;;  %v1148_v41 = vsel %vm1116_vm12, %v1132_v8, %v1100_v26 }
 0x21a   : > { %v802_v25 = vand.u32 2147483647, %v2917_v12  ;;  %v1087_v61 = vmul.f32 %v2217_v50, %v1007_v45  ;;  %v1101_v62 = vsub.f32 1.0, %v1085_v7  ;;  %v1164_v10 = vadd.f32 1.0, %v1148_v41  ;;  %v3155_v14 = vld [vmem:[#allocation14_spill] sm:$0xff]  ;;  %v3156_v45 = vld [vmem:[#allocation17_spill] sm:$0xff] }
 0x21b   : > { %v883_v36 = vadd.f32 -1.4531521, %v867_v58  ;;  %v816_v27 = vmul.f32 0.3275911, %v800_v48  ;;  %v1102_v24 = vsub.f32 1.0, %v1086_v15  ;;  %vm1119_vm15 = vcmp.lt.f32.partialorder %v3150_v1, 0.0 }
 0x21c   : > { %v817_v23 = vmul.f32 0.3275911, %v801_v34  ;;  %v818_v54 = vmul.f32 0.3275911, %v802_v25  ;;  %v1103_v19 = vsub.f32 1.0, %v1087_v61  ;;  %v1133_v30 = vsub.f32 0.0, %v1101_v62 }
 0x21d   : > { %v899_v32 = vmul.f32 %v3147_v17, %v883_v36  ;;  %v1180_v21 = vmul.f32 %v1164_v10, %v3149_v38  ;;  %v832_v16 = vadd.f32 1.0, %v816_v27  ;;  %v1134_v59 = vsub.f32 0.0, %v1102_v24  ;;  %v3157_v15 = vld [vmem:[#allocation18_spill] sm:$0xff] }
 0x21e   : > { %v833_v35 = vadd.f32 1.0, %v817_v23  ;;  %v834_v43 = vadd.f32 1.0, %v818_v54  ;;  %v1135_v55 = vsub.f32 0.0, %v1103_v19  ;;  %v1149_v22 = vsel %vm1117_vm13, %v1133_v30, %v1101_v62 }
 0x21f   : > { %v915_v6 = vadd.f32 1.4214138, %v899_v32  ;;  %1196 = vst [vmem:[#allocation2 + $0x60] sm:$0xff] %v1180_v21  ;;  %2218 = vrcp.f32 %v832_v16  ;;  %v1150_v39 = vsel %vm1118_vm14, %v1134_v59, %v1102_v24  ;;  %v1165_v28 = vadd.f32 1.0, %v1149_v22  ;;  %v3159_v21 = vld [vmem:[#allocation3_spill] sm:$0xff] }
 0x220   : > { %2220 = vrcp.f32 %v833_v35  ;;  %v3152_v44 = vsub.f32 0.0, %v3151_v13  ;;  %v1151_v47 = vsel %vm1119_vm15, %v1135_v55, %v1103_v19  ;;  %v1166_v46 = vadd.f32 1.0, %v1150_v39 }
 0x221   : > { %v931_v18 = vmul.f32 %v3147_v17, %v915_v6  ;;  %2222 = vrcp.f32 %v834_v43  ;;  %v783_v3 = vmul.f32 0.5, %v3153_v0  ;;  %v1167_v56 = vadd.f32 1.0, %v1151_v47 }
 0x222   : > { %v1028_v60 = vmul.f32 %v3152_v44, %v3151_v13  ;;  %v1181_v57 = vmul.f32 %v1165_v28, %v3154_v9  ;;  %v1182_v20 = vmul.f32 %v1166_v46, %v3155_v14  ;;  %v1008_v40 = vsub.f32 0.0, %v800_v48 }
 0x223   : > { %v947_v51 = vadd.f32 -0.28449672, %v931_v18  ;;  %v1183_v26 = vmul.f32 %v1167_v56, %v783_v3  ;;  %v1009_v29 = vsub.f32 0.0, %v801_v34  ;;  %v868_v37 = vmul.f32 1.0614054, %v3156_v45 }
 0x224   : > { %1197 = vst [vmem:[#allocation2 + $0x68] sm:$0xff] %v1181_v57  ;;  %v1048_v53 = vmul.f32 1.442695, %v1028_v60  ;;  %1198 = vst [vmem:[#allocation2 + $0x70] sm:$0xff] %v1182_v20  ;;  %v1010_v31 = vsub.f32 0.0, %v802_v25  ;;  %v1024_v8 = vmul.f32 %v1008_v40, %v800_v48  ;;  %v771_v16 = vmul.f32 0.5, %v3159_v21 }
 0x225   : > { %v963_v2 = vmul.f32 %v3147_v17, %v947_v51  ;;  %1199 = vst [vmem:[#allocation2 + $0x78] sm:$0x7f] %v1183_v26  ;;  %v884_v58 = vadd.f32 -1.4531521, %v868_v37  ;;  %v1025_v7 = vmul.f32 %v1009_v29, %v801_v34  ;;  %vm1104_vm2 = vcmp.lt.f32.partialorder %v2910_v63, 0.0 }
 0x226   : > { %2224 = vpow2.f32 %v1048_v53  ;;  %v1026_v50 = vmul.f32 %v1010_v31, %v802_v25  ;;  %v1040_v36 = vmul.f32 1.442695, %v1024_v8  ;;  %vm1105_vm3 = vcmp.lt.f32.partialorder %v2913_v4, 0.0 }
 0x227   : > { %v979_v5 = vadd.f32 0.2548296, %v963_v2  ;;  %v900_v33 = vmul.f32 %v3156_v45, %v884_v58  ;;  %v1042_v10 = vmul.f32 1.442695, %v1025_v7  ;;  %v3161_v7 = vld [vmem:[#allocation5_spill] sm:$0xff]  ;;  %vm1106_vm4 = vcmp.lt.f32.partialorder %v2917_v12, 0.0 }
 0x228   : > { %v1044_v19 = vmul.f32 1.442695, %v1026_v50  ;;  %2226 = vpow2.f32 %v1040_v36  ;;  %v1242_v12 = vld [vmem:[#allocation2 + $0x52] ss:$2 sm:$0xff] }
 0x229   : > { %v995_v42 = vmul.f32 %v3147_v17, %v979_v5  ;;  %v916_v61 = vadd.f32 1.4214138, %v900_v33  ;;  %v3158_v17 = vld [vmem:[#allocation4_spill] sm:$0xff]  ;;  %2228 = vpow2.f32 %v1042_v10  ;;  %v772_v33 = vmul.f32 0.5, %v3161_v7 }
 0x22a   : > { %vm1107_vm0 = vcmp.lt.f32.partialorder %v3158_v17, 0.0  ;;  %2230 = vpow2.f32 %v1044_v19  ;;  %v3160_v5 = vld [vmem:[#allocation8_spill] sm:$0xff] }
 0x22b   : > { %v1075_v41 = vmul.f32 %v3157_v15, %v995_v42  ;;  %v932_v54 = vmul.f32 %v3156_v45, %v916_v61  ;;  %vm1108_vm1 = vcmp.lt.f32.partialorder %v3160_v5, 0.0 }
 0x22c   : > { %v2219_v62 = vpop.eup %2218  ;;  %v1230_v5 = vld [vmem:[#allocation2 + $0x71] ss:$2 sm:$0x7f] }
 0x22d   : > { %v1091_v27 = vsub.f32 1.0, %v1075_v41  ;;  %v2221_v24 = vpop.eup %2220  ;;  %v864_v23 = vmul.f32 1.0614054, %v2219_v62  ;;  %v948_v25 = vadd.f32 -0.28449672, %v932_v54 }
 0x22e   : > { %v2223_v48 = vpop.eup %2222  ;;  %v865_v32 = vmul.f32 1.0614054, %v2221_v24 }
 0x22f   : > { %v1123_v34 = vsub.f32 0.0, %v1091_v27  ;;  %v866_v30 = vmul.f32 1.0614054, %v2223_v48  ;;  %v880_v38 = vadd.f32 -1.4531521, %v864_v23  ;;  %v964_v55 = vmul.f32 %v3156_v45, %v948_v25 }
 0x230   : > { %v881_v59 = vadd.f32 -1.4531521, %v865_v32  ;;  %v769_v25 = vmul.f32 0.5, %v2737_v52 }
 0x231   : > { %v1139_v35 = vsel %vm1107_vm0, %v1123_v34, %v1091_v27  ;;  %v882_v43 = vadd.f32 -1.4531521, %v866_v30  ;;  %v896_v6 = vmul.f32 %v2219_v62, %v880_v38  ;;  %v980_v13 = vadd.f32 0.2548296, %v964_v55  ;;  %v1240_v55 = vld [vmem:[#allocation2 + $0x42] ss:$2 sm:$0xff] }
 0x232   : > { %v1155_v1 = vadd.f32 1.0, %v1139_v35  ;;  %v897_v22 = vmul.f32 %v2221_v24, %v881_v59  ;;  %v770_v59 = vmul.f32 0.5, %v3146_v11 }
 0x233   : > { %v898_v39 = vmul.f32 %v2223_v48, %v882_v43  ;;  %v912_v28 = vadd.f32 1.4214138, %v896_v6  ;;  %v996_v46 = vmul.f32 %v3156_v45, %v980_v13  ;;  %v2225_v0 = vpop.eup %2224 }
 0x234   : > { %v1171_v18 = vmul.f32 %v1155_v1, %v771_v16  ;;  %v913_v44 = vadd.f32 1.4214138, %v897_v22  ;;  %v1238_v1 = vld [vmem:[#allocation2 + $0x32] ss:$2 sm:$0xff] }
 0x235   : > { %v914_v60 = vadd.f32 1.4214138, %v898_v39  ;;  %v928_v47 = vmul.f32 %v2219_v62, %v912_v28  ;;  %v1076_v57 = vmul.f32 %v2225_v0, %v996_v46  ;;  %v2227_v37 = vpop.eup %2226 }
 0x236   : > { %1187 = vst [vmem:[#allocation2 + $0x18] sm:$0xff] %v1171_v18  ;;  %v929_v3 = vmul.f32 %v2221_v24, %v913_v44  ;;  %v2229_v8 = vpop.eup %2228 }
 0x237   : > { %v930_v56 = vmul.f32 %v2223_v48, %v914_v60  ;;  %v944_v9 = vadd.f32 -0.28449672, %v928_v47  ;;  %v1092_v40 = vsub.f32 1.0, %v1076_v57  ;;  %v2231_v41 = vpop.eup %2230 }
 0x238   : > { %v945_v51 = vadd.f32 -0.28449672, %v929_v3  ;;  %v1255_v3 = vpack.c.bf16 %v1242_v12, %v1240_v55 }
 0x239   : > { %v946_v14 = vadd.f32 -0.28449672, %v930_v56  ;;  %v960_v20 = vmul.f32 %v2219_v62, %v944_v9  ;;  %v1124_v53 = vsub.f32 0.0, %v1092_v40  ;;  %v1206_v56 = vld [vmem:[#allocation2 + $0x30] ss:$2 sm:$0xff] }
 0x23a   : > { %v961_v26 = vmul.f32 %v2221_v24, %v945_v51  ;;  %v1244_v9 = vld [vmem:[#allocation2 + $0x62] ss:$2 sm:$0xff]  ;;  %v1246_v51 = vld [vmem:[#allocation2 + $0x72] ss:$2 sm:$0x7f] }
 0x23b   : > { %v962_v2 = vmul.f32 %v2223_v48, %v946_v14  ;;  %v976_v29 = vadd.f32 0.2548296, %v960_v20  ;;  %v1140_v42 = vsel %vm1108_vm1, %v1124_v53, %v1092_v40  ;;  %v1224_v14 = vld [vmem:[#allocation2 + $0x41] ss:$2 sm:$0xff]  ;;  %v1226_v20 = vld [vmem:[#allocation2 + $0x51] ss:$2 sm:$0xff] }
 0x23c   : > { %v977_v31 = vadd.f32 0.2548296, %v961_v26  ;;  %v1156_v15 = vadd.f32 1.0, %v1140_v42  ;;  %v1258_v26 = vpack.c.bf16 %v1246_v51, %v1244_v9  ;;  %v1210_v53 = vld [vmem:[#allocation2 + $0x50] ss:$2 sm:$0xff] }
 0x23d   : > { %v978_v58 = vadd.f32 0.2548296, %v962_v2  ;;  %v992_v45 = vmul.f32 %v2219_v62, %v976_v29  ;;  %v1254_v2 = vpack.c.bf16 %v1226_v20, %v1224_v14  ;;  %v1208_v29 = vld [vmem:[#allocation2 + $0x40] ss:$2 sm:$0xff] }
 0x23e   : > { %v993_v50 = vmul.f32 %v2221_v24, %v977_v31  ;;  %v1172_v27 = vmul.f32 %v1156_v15, %v772_v33  ;;  %v768_v24 = vmul.f32 0.5, %v2730_v49  ;;  %v1222_v49 = vld [vmem:[#allocation2 + $0x31] ss:$2 sm:$0xff]  ;;  %v1253_v31 = vpack.c.bf16 %v1210_v53, %v1208_v29 }
 0x23f   : > { %v994_v36 = vmul.f32 %v2223_v48, %v978_v58  ;;  %v1072_v61 = vmul.f32 %v2227_v37, %v992_v45  ;;  %v1228_v37 = vld [vmem:[#allocation2 + $0x61] ss:$2 sm:$0xff]  ;;  %v1212_v58 = vld [vmem:[#allocation2 + $0x60] ss:$2 sm:$0xff] }
 0x240   : > { %v1073_v10 = vmul.f32 %v2229_v8, %v993_v50  ;;  %1188 = vst [vmem:[#allocation2 + $0x20] sm:$0xff] %v1172_v27  ;;  %v1257_v8 = vpack.c.bf16 %v1230_v5, %v1228_v37  ;;  %v1214_v45 = vld [vmem:[#allocation2 + $0x70] ss:$2 sm:$0x7f] }
 0x241   : > { %v1074_v23 = vmul.f32 %v2231_v41, %v994_v36  ;;  %v1088_v54 = vsub.f32 1.0, %v1072_v61  ;;  %v1256_v42 = vpack.c.bf16 %v1214_v45, %v1212_v58 }
 0x242   : > { %v1089_v32 = vsub.f32 1.0, %v1073_v10 }
 0x243   : > { %v1090_v19 = vsub.f32 1.0, %v1074_v23  ;;  %v1120_v17 = vsub.f32 0.0, %v1088_v54 }
 0x244   : > { %v1121_v34 = vsub.f32 0.0, %v1089_v32 }
 0x245   : > { %v1122_v62 = vsub.f32 0.0, %v1090_v19  ;;  %v1136_v30 = vsel %vm1104_vm2, %v1120_v17, %v1088_v54 }
 0x246   : > { %v1137_v48 = vsel %vm1105_vm3, %v1121_v34, %v1089_v32  ;;  %v1152_v38 = vadd.f32 1.0, %v1136_v30 }
 0x247   : > { %v1138_v21 = vsel %vm1106_vm4, %v1122_v62, %v1090_v19  ;;  %v1153_v16 = vadd.f32 1.0, %v1137_v48  ;;  %v1236_v4 = vld [vmem:[#allocation2 + $0x22] ss:$2 sm:$0xff]  ;;  %v1220_v28 = vld [vmem:[#allocation2 + $0x21] ss:$2 sm:$0xff] }
 0x248   : > { %v1154_v35 = vadd.f32 1.0, %v1138_v21  ;;  %v1168_v43 = vmul.f32 %v1152_v38, %v768_v24  ;;  %v1252_v44 = vpack.c.bf16 %v1238_v1, %v1236_v4  ;;  %v1251_v0 = vpack.c.bf16 %v1222_v49, %v1220_v28  ;;  %v1204_v57 = vld [vmem:[#allocation2 + $0x20] ss:$2 sm:$0xff] }
 0x249   : > { %v1169_v63 = vmul.f32 %v1153_v16, %v769_v25  ;;  %v1250_v40 = vpack.c.bf16 %v1206_v56, %v1204_v57 }
 0x24a   : > { %v1170_v6 = vmul.f32 %v1154_v35, %v770_v59  ;;  %1184 = vst [vmem:[#allocation2] sm:$0xff] %v1168_v43 }
 0x24b   : > { %1185 = vst [vmem:[#allocation2 + $0x8] sm:$0xff] %v1169_v63 }
 0x24c   : > { %1186 = vst [vmem:[#allocation2 + $0x10] sm:$0xff] %v1170_v6 }
 0x252   : > { %v1216_v22 = vld [vmem:[#allocation2 + $0x1] ss:$2 sm:$0xff]  ;;  %v1200_v39 = vld [vmem:[#allocation2] ss:$2 sm:$0xff] }
 0x253   : > { %v1218_v52 = vld [vmem:[#allocation2 + $0x11] ss:$2 sm:$0xff]  ;;  %v1232_v18 = vld [vmem:[#allocation2 + $0x2] ss:$2 sm:$0xff]  ;;  %v1234_v13 = vld [vmem:[#allocation2 + $0x12] ss:$2 sm:$0xff] }
 0x254   : > { %v1248_v11 = vpack.c.bf16 %v1218_v52, %v1216_v22  ;;  %v1249_v60 = vpack.c.bf16 %v1234_v13, %v1232_v18  ;;  %v1202_v47 = vld [vmem:[#allocation2 + $0x10] ss:$2 sm:$0xff] }
 0x255   : > { %v1247_v46 = vpack.c.bf16 %v1202_v47, %v1200_v39 }
 0x256   : > { %1483 = vmatprep.mubr.bf16.mxu1 %v1248_v11  ;;  %2042 = vmatprep.mubr.bf16.mxu0 %v1249_v60 }
 0x257   : > { %1484 = vmatmul.mubr.bf16.vlgmr.msra.gmra.mxu1 %v1247_v46  ;;  %2043 = vmatmul.mubr.bf16.vlgmr.msra.gmra.mxu0 %v1252_v44 }
 0x258   : > { %1491 = vmatprep.mubr.bf16.mxu1 %v1251_v0  ;;  %2046 = vmatprep.mubr.bf16.mxu0 %v1255_v3 }
 0x25f   : > { %1492 = vmatmul.mubr.bf16.gmra.mxu1 %v1250_v40  ;;  %2047 = vmatmul.mubr.bf16.gmra.mxu0 %v1258_v26 }
 0x260   : > { %1499 = vmatprep.mubr.bf16.mxu1 %v1254_v2 }
 0x267   : > { %1500 = vmatmul.mubr.bf16.gmra.mxu1 %v1253_v31 }
 0x268   : > { %1507 = vmatprep.mubr.bf16.mxu1 %v1257_v8 }
 0x26f   : > { %1508 = vmatmul.mubr.bf16.gmra.mxu1 %v1256_v42 }
 0x317   : > { %v1972_v7 = vpop.f32.mrf.mxu1  ;;  %v2044_v33 = vpop.f32.mrf.mxu0 }
 0x319   : > { %v1973_v50 = vpop.f32.mrf.mxu1  ;;  %v1550_v15 = vpop.f32.mrf.mxu0 }
 0x31a   : > { %v1974_v41 = vadd.f32 %v1973_v50, %v1972_v7 }
 0x31b   : > { %v1975_v36 = vpop.f32.mrf.mxu1  ;;  %v2045_v61 = vpop.f32.mrf.mxu0 }
 0x31c   : > { %v2958_v10 = vadd.f32 %v1974_v41, %v1550_v15 }
 0x31d   : > { %v1976_v27 = vpop.f32.mrf.mxu1  ;;  %v1553_v32 = vpop.f32.mrf.mxu0 }
 0x31e   : > { %v2961_v23 = vmul.f32 0.70710677, %v2958_v10  ;;  %v1977_v54 = vadd.f32 %v1976_v27, %v1975_v36 }
 0x31f   : > { %v1978_v19 = vpop.f32.mrf.mxu1  ;;  %v2048_v48 = vpop.f32.mrf.mxu0 }
 0x320   : > { %v1597_v17 = vand.u32 2147483647, %v2961_v23  ;;  %v2964_v34 = vadd.f32 %v1977_v54, %v1553_v32  ;;  %vm1749_vm5 = vcmp.lt.f32.partialorder %v2961_v23, 0.0 }
 0x321   : > { %v1979_v62 = vpop.f32.mrf.mxu1  ;;  %v1566_v6 = vpop.f32.mrf.mxu0 }
 0x322   : > { %v1605_v30 = vmul.f32 0.3275911, %v1597_v17  ;;  %v2967_v24 = vmul.f32 0.70710677, %v2964_v34  ;;  %v1980_v38 = vadd.f32 %v1979_v62, %v1978_v19  ;;  %v1701_v28 = vsub.f32 0.0, %v1597_v17 }
 0x323   : > { %v1981_v25 = vpop.f32.mrf.mxu1  ;;  %v2049_v18 = vpop.f32.mrf.mxu0 }
 0x324   : > { %v1613_v21 = vadd.f32 1.0, %v1605_v30  ;;  %v1598_v16 = vand.u32 2147483647, %v2967_v24  ;;  %v2970_v59 = vadd.f32 %v2044_v33, %v1980_v38  ;;  %v1709_v56 = vmul.f32 %v1701_v28, %v1597_v17 }
 0x325   : > { %v1982_v35 = vpop.f32.mrf.mxu1  ;;  %v1569_v51 = vpop.f32.mrf.mxu0  ;;  %vm1750_vm6 = vcmp.lt.f32.partialorder %v2967_v24, 0.0 }
 0x326   : > { %2232 = vrcp.f32 %v1613_v21  ;;  %v1606_v43 = vmul.f32 0.3275911, %v1598_v16  ;;  %v2973_v63 = vmul.f32 0.70710677, %v2970_v59  ;;  %v1983_v4 = vadd.f32 %v1982_v35, %v1981_v25 }
 0x327   : > { %v1984_v1 = vpop.f32.mrf.mxu1  ;;  %v1702_v9 = vsub.f32 0.0, %v1598_v16  ;;  %v1717_v5 = vmul.f32 1.442695, %v1709_v56  ;;  %v3010_v35 = vmul.f32 0.5, %v2958_v10 }
 0x328   : > { %v1614_v49 = vadd.f32 1.0, %v1606_v43  ;;  %v1599_v55 = vand.u32 2147483647, %v2973_v63  ;;  %v2976_v12 = vadd.f32 %v2045_v61, %v1983_v4  ;;  %vm1751_vm7 = vcmp.lt.f32.partialorder %v2973_v63, 0.0 }
 0x329   : > { %v1985_v22 = vpop.f32.mrf.mxu1  ;;  %v1710_v31 = vmul.f32 %v1702_v9, %v1598_v16 }
 0x32a   : > { %2234 = vrcp.f32 %v1614_v49  ;;  %v1986_v39 = vadd.f32 %v1985_v22, %v1984_v1  ;;  %v1607_v52 = vmul.f32 0.3275911, %v1599_v55  ;;  %v2979_v13 = vmul.f32 0.70710677, %v2976_v12 }
 0x32b   : > { %v1987_v44 = vpop.f32.mrf.mxu1  ;;  %v1703_v42 = vsub.f32 0.0, %v1599_v55  ;;  %v1719_v27 = vmul.f32 1.442695, %v1710_v31 }
 0x32c   : > { %v2981_v11 = vadd.f32 %v1986_v39, %v1566_v6  ;;  %v1615_v60 = vadd.f32 1.0, %v1607_v52  ;;  %v1600_v47 = vand.u32 2147483647, %v2979_v13  ;;  %vm1752_vm8 = vcmp.lt.f32.partialorder %v2979_v13, 0.0 }
 0x32d   : > { %v1988_v46 = vpop.f32.mrf.mxu1  ;;  %v1711_v62 = vmul.f32 %v1703_v42, %v1599_v55 }
 0x32e   : > { %v2985_v0 = vmul.f32 0.70710677, %v2981_v11  ;;  %v1989_v3 = vadd.f32 %v1988_v46, %v1987_v44  ;;  %2236 = vrcp.f32 %v1615_v60  ;;  %v1608_v57 = vmul.f32 0.3275911, %v1600_v47 }
 0x32f   : > { %v1990_v14 = vpop.f32.mrf.mxu1  ;;  %v1721_v55 = vmul.f32 1.442695, %v1711_v62  ;;  %v3022_v46 = vmul.f32 0.5, %v2964_v34 }
 0x330   : > { %v1601_v20 = vand.u32 2147483647, %v2985_v0  ;;  %v2988_v40 = vadd.f32 %v1989_v3, %v1569_v51  ;;  %v1616_v26 = vadd.f32 1.0, %v1608_v57  ;;  %vm1753_vm9 = vcmp.lt.f32.partialorder %v2985_v0, 0.0 }
 0x331   : > { %v1991_v2 = vpop.f32.mrf.mxu1 }
 0x332   : > { %v1609_v29 = vmul.f32 0.3275911, %v1601_v20  ;;  %v2991_v53 = vmul.f32 0.70710677, %v2988_v40  ;;  %2238 = vrcp.f32 %v1616_v26  ;;  %v1992_v8 = vadd.f32 %v1991_v2, %v1990_v14 }
 0x333   : > { %v2993_v37 = vpop.eup %2232  ;;  %v1993_v58 = vpop.f32.mrf.mxu1  ;;  %v1705_v43 = vsub.f32 0.0, %v1601_v20 }
 0x334   : > { %v1629_v45 = vmul.f32 1.0614054, %v2993_v37  ;;  %v1617_v7 = vadd.f32 1.0, %v1609_v29  ;;  %v1602_v33 = vand.u32 2147483647, %v2991_v53  ;;  %v2997_v50 = vadd.f32 %v2048_v48, %v1992_v8 }
 0x335   : > { %v1994_v15 = vpop.f32.mrf.mxu1  ;;  %v1704_v48 = vsub.f32 0.0, %v1600_v47  ;;  %v1713_v56 = vmul.f32 %v1705_v43, %v1601_v20  ;;  %vm1754_vm10 = vcmp.lt.f32.partialorder %v2991_v53, 0.0 }
 0x336   : > { %v1637_v41 = vadd.f32 -1.4531521, %v1629_v45  ;;  %2240 = vrcp.f32 %v1617_v7  ;;  %v1610_v36 = vmul.f32 0.3275911, %v1602_v33  ;;  %v3002_v54 = vmul.f32 0.70710677, %v2997_v50 }
 0x337   : > { %v2999_v61 = vpop.eup %2234  ;;  %2242 = vpow2.f32 %v1717_v5  ;;  %v1995_v32 = vadd.f32 %v1994_v15, %v1993_v58  ;;  %v1712_v28 = vmul.f32 %v1704_v48, %v1600_v47  ;;  %v1706_v52 = vsub.f32 0.0, %v1602_v33 }
 0x338   : > { %v1645_v19 = vmul.f32 %v2993_v37, %v1637_v41  ;;  %v1630_v17 = vmul.f32 1.0614054, %v2999_v61  ;;  %v1618_v30 = vadd.f32 1.0, %v1610_v36  ;;  %v1603_v38 = vand.u32 2147483647, %v3002_v54 }
 0x339   : > { %v3007_v25 = vadd.f32 %v2049_v18, %v1995_v32  ;;  %v1723_v2 = vmul.f32 1.442695, %v1712_v28  ;;  %v1714_v31 = vmul.f32 %v1706_v52, %v1602_v33  ;;  %v1725_v42 = vmul.f32 1.442695, %v1713_v56 }
 0x33a   : > { %v1653_v21 = vadd.f32 1.4214138, %v1645_v19  ;;  %v1638_v16 = vadd.f32 -1.4531521, %v1630_v17  ;;  %2244 = vrcp.f32 %v1618_v30  ;;  %v1611_v6 = vmul.f32 0.3275911, %v1603_v38 }
 0x33b   : > { %2246 = vpow2.f32 %v1719_v27  ;;  %v3012_v4 = vpop.eup %2236  ;;  %v3017_v22 = vmul.f32 0.70710677, %v3007_v25  ;;  %v1707_v29 = vsub.f32 0.0, %v1603_v38  ;;  %v1727_v30 = vmul.f32 1.442695, %v1714_v31 }
 0x33c   : > { %v1661_v1 = vmul.f32 %v2993_v37, %v1653_v21  ;;  %v1646_v49 = vmul.f32 %v2999_v61, %v1638_v16  ;;  %v1631_v39 = vmul.f32 1.0614054, %v3012_v4  ;;  %v1619_v18 = vadd.f32 1.0, %v1611_v6 }
 0x33d   : > { %v1604_v60 = vand.u32 2147483647, %v3017_v22  ;;  %v1715_v32 = vmul.f32 %v1707_v29, %v1603_v38  ;;  %vm1755_vm11 = vcmp.lt.f32.partialorder %v3002_v54, 0.0  ;;  %vm1756_vm12 = vcmp.lt.f32.partialorder %v3017_v22, 0.0 }
 0x33e   : > { %v1669_v10 = vadd.f32 -0.28449672, %v1661_v1  ;;  %v1654_v44 = vadd.f32 1.4214138, %v1646_v49  ;;  %v1639_v3 = vadd.f32 -1.4531521, %v1631_v39  ;;  %2248 = vrcp.f32 %v1619_v18 }
 0x33f   : > { %v3024_v9 = vpop.eup %2238  ;;  %2250 = vpow2.f32 %v1721_v55  ;;  %v1612_v47 = vmul.f32 0.3275911, %v1604_v60  ;;  %v1708_v16 = vsub.f32 0.0, %v1604_v60  ;;  %v3045_v55 = vmul.f32 0.5, %v2970_v59 }
 0x340   : > { %v1677_v57 = vmul.f32 %v2993_v37, %v1669_v10  ;;  %v1662_v51 = vmul.f32 %v2999_v61, %v1654_v44  ;;  %v1647_v14 = vmul.f32 %v3012_v4, %v1639_v3  ;;  %v1632_v26 = vmul.f32 1.0614054, %v3024_v9 }
 0x341   : > { %v1620_v8 = vadd.f32 1.0, %v1612_v47  ;;  %v1729_v52 = vmul.f32 1.442695, %v1715_v32 }
 0x342   : > { %v1685_v5 = vadd.f32 0.2548296, %v1677_v57  ;;  %v1670_v34 = vadd.f32 -0.28449672, %v1662_v51  ;;  %v1655_v58 = vadd.f32 1.4214138, %v1647_v14 }
 0x343   : > { %v3030_v20 = vpop.eup %2240  ;;  %v1640_v45 = vadd.f32 -1.4531521, %v1632_v26  ;;  %2252 = vrcp.f32 %v1620_v8 }
 0x344   : > { %v2243_v7 = vpop.eup %2242  ;;  %v1693_v15 = vmul.f32 %v2993_v37, %v1685_v5  ;;  %v1678_v41 = vmul.f32 %v2999_v61, %v1670_v34  ;;  %v1633_v36 = vmul.f32 1.0614054, %v3030_v20  ;;  %v1663_v27 = vmul.f32 %v3012_v4, %v1655_v58 }
 0x345   : > { %v1648_v33 = vmul.f32 %v3024_v9, %v1640_v45  ;;  %2254 = vpow2.f32 %v1723_v2 }
 0x346   : > { %v1733_v19 = vmul.f32 %v2243_v7, %v1693_v15  ;;  %v1686_v17 = vadd.f32 0.2548296, %v1678_v41  ;;  %v1641_v62 = vadd.f32 -1.4531521, %v1633_v36  ;;  %v1671_v37 = vadd.f32 -0.28449672, %v1663_v27 }
 0x347   : > { %v3038_v48 = vpop.eup %2244  ;;  %v1656_v21 = vadd.f32 1.4214138, %v1648_v33  ;;  %2256 = vpow2.f32 %v1725_v42 }
 0x348   : > { %v2247_v43 = vpop.eup %2246  ;;  %v1741_v6 = vsub.f32 1.0, %v1733_v19  ;;  %v1694_v1 = vmul.f32 %v2999_v61, %v1686_v17  ;;  %v1649_v49 = vmul.f32 %v3030_v20, %v1641_v62  ;;  %v1634_v38 = vmul.f32 1.0614054, %v3038_v48 }
 0x349   : > { %v1679_v39 = vmul.f32 %v3012_v4, %v1671_v37  ;;  %v1664_v28 = vmul.f32 %v3024_v9, %v1656_v21  ;;  %2258 = vpow2.f32 %v1727_v30  ;;  %v1716_v61 = vmul.f32 %v1708_v16, %v1604_v60 }
 0x34a   : > { %v1757_v18 = vsub.f32 0.0, %v1741_v6  ;;  %v1734_v10 = vmul.f32 %v2247_v43, %v1694_v1  ;;  %v1657_v44 = vadd.f32 1.4214138, %v1649_v49  ;;  %v1642_v3 = vadd.f32 -1.4531521, %v1634_v38 }
 0x34b   : > { %v1687_v56 = vadd.f32 0.2548296, %v1679_v39  ;;  %v1672_v57 = vadd.f32 -0.28449672, %v1664_v28  ;;  %v3050_v51 = vpop.eup %2248  ;;  %2260 = vpow2.f32 %v1729_v52  ;;  %v1731_v36 = vmul.f32 1.442695, %v1716_v61 }
 0x34c   : > { %v1765_v59 = vsel %vm1749_vm5, %v1757_v18, %v1741_v6  ;;  %v1742_v47 = vsub.f32 1.0, %v1734_v10  ;;  %v1665_v14 = vmul.f32 %v3030_v20, %v1657_v44  ;;  %v1650_v26 = vmul.f32 %v3038_v48, %v1642_v3  ;;  %v2251_v2 = vpop.eup %2250 }
 0x34d   : > { %v1773_v29 = vadd.f32 1.0, %v1765_v59  ;;  %v1695_v5 = vmul.f32 %v3012_v4, %v1687_v56  ;;  %v1680_v34 = vmul.f32 %v3024_v9, %v1672_v57  ;;  %v1635_v31 = vmul.f32 1.0614054, %v3050_v51 }
 0x34e   : > { %v1758_v23 = vsub.f32 0.0, %v1742_v47  ;;  %v1673_v60 = vadd.f32 -0.28449672, %v1665_v14  ;;  %v1658_v8 = vadd.f32 1.4214138, %v1650_v26  ;;  %2262 = vpow2.f32 %v1731_v36 }
 0x34f   : > { %v1781_v58 = vmul.f32 %v1773_v29, %v3010_v35  ;;  %v1735_v45 = vmul.f32 %v2251_v2, %v1695_v5  ;;  %v1688_v42 = vadd.f32 0.2548296, %v1680_v34  ;;  %v1643_v7 = vadd.f32 -1.4531521, %v1635_v31 }
 0x350   : > { %v1766_v4 = vsel %vm1750_vm6, %v1758_v23, %v1742_v47  ;;  %v1681_v15 = vmul.f32 %v3030_v20, %v1673_v60  ;;  %v1666_v41 = vmul.f32 %v3038_v48, %v1658_v8  ;;  %v3069_v27 = vpop.eup %2252  ;;  %v1584_v59 = vmul.f32 0.5, %v2976_v12 }
 0x351   : > { %1789 = vst [vmem:[%s3062_s11] sm:$0xff] %v1781_v58  ;;  %v1774_v33 = vadd.f32 1.0, %v1766_v4  ;;  %v1743_v32 = vsub.f32 1.0, %v1735_v45  ;;  %v1696_v19 = vmul.f32 %v3024_v9, %v1688_v42  ;;  %v1651_v35 = vmul.f32 %v3050_v51, %v1643_v7 }
 0x352   : > { %v2255_v17 = vpop.eup %2254  ;;  %v1689_v62 = vadd.f32 0.2548296, %v1681_v15  ;;  %v1674_v30 = vadd.f32 -0.28449672, %v1666_v41  ;;  %v1636_v24 = vmul.f32 1.0614054, %v3069_v27 }
 0x353   : > { %v1782_v37 = vmul.f32 %v1774_v33, %v3022_v46  ;;  %v1759_v21 = vsub.f32 0.0, %v1743_v32  ;;  %v1736_v16 = vmul.f32 %v2255_v17, %v1696_v19  ;;  %v1659_v43 = vadd.f32 1.4214138, %v1651_v35 }
 0x354   : > { %v2257_v6 = vpop.eup %2256  ;;  %v1697_v1 = vmul.f32 %v3030_v20, %v1689_v62  ;;  %v1682_v49 = vmul.f32 %v3038_v48, %v1674_v30  ;;  %v1644_v9 = vadd.f32 -1.4531521, %v1636_v24  ;;  %v1585_v12 = vmul.f32 0.5, %v2981_v11 }
 0x355   : > { %1790 = vst [vmem:[%s3062_s11 + $0x8] sm:$0xff] %v1782_v37  ;;  %v1767_v38 = vsel %vm1751_vm7, %v1759_v21, %v1743_v32  ;;  %v1744_v39 = vsub.f32 1.0, %v1736_v16  ;;  %v1667_v28 = vmul.f32 %v3050_v51, %v1659_v43  ;;  %v1586_v15 = vmul.f32 0.5, %v2988_v40 }
 0x356   : > { %v1775_v52 = vadd.f32 1.0, %v1767_v38  ;;  %v1737_v46 = vmul.f32 %v2257_v6, %v1697_v1  ;;  %v1690_v18 = vadd.f32 0.2548296, %v1682_v49  ;;  %v1652_v10 = vmul.f32 %v3069_v27, %v1644_v9  ;;  %v2259_v20 = vpop.eup %2258 }
 0x357   : > { %v1760_v63 = vsub.f32 0.0, %v1744_v39  ;;  %v1675_v44 = vadd.f32 -0.28449672, %v1667_v28  ;;  %v1587_v35 = vmul.f32 0.5, %v2997_v50 }
 0x358   : > { %v1783_v3 = vmul.f32 %v1775_v52, %v3045_v55  ;;  %v1745_v56 = vsub.f32 1.0, %v1737_v46  ;;  %v1698_v57 = vmul.f32 %v3038_v48, %v1690_v18  ;;  %v1660_v61 = vadd.f32 1.4214138, %v1652_v10  ;;  %v2261_v5 = vpop.eup %2260 }
 0x359   : > { %v1768_v47 = vsel %vm1752_vm8, %v1760_v63, %v1744_v39  ;;  %v1683_v14 = vmul.f32 %v3050_v51, %v1675_v44 }
 0x35a   : > { %1791 = vst [vmem:[%s3062_s11 + $0x10] sm:$0xff] %v1783_v3  ;;  %v1776_v26 = vadd.f32 1.0, %v1768_v47  ;;  %v1761_v2 = vsub.f32 0.0, %v1745_v56  ;;  %v1738_v29 = vmul.f32 %v2259_v20, %v1698_v57  ;;  %v1668_v13 = vmul.f32 %v3069_v27, %v1660_v61 }
 0x35b   : > { %v1691_v55 = vadd.f32 0.2548296, %v1683_v14  ;;  %v2263_v36 = vpop.eup %2262 }
 0x35c   : > { %v1784_v34 = vmul.f32 %v1776_v26, %v1584_v59  ;;  %v1769_v48 = vsel %vm1753_vm9, %v1761_v2, %v1745_v56  ;;  %v1746_v31 = vsub.f32 1.0, %v1738_v29  ;;  %v1676_v23 = vadd.f32 -0.28449672, %v1668_v13 }
 0x35d   : > { %v1777_v60 = vadd.f32 1.0, %v1769_v48  ;;  %v1699_v8 = vmul.f32 %v3050_v51, %v1691_v55 }
 0x35e   : > { %1792 = vst [vmem:[%s3062_s11 + $0x18] sm:$0xff] %v1784_v34  ;;  %v1762_v58 = vsub.f32 0.0, %v1746_v31  ;;  %v1684_v45 = vmul.f32 %v3069_v27, %v1676_v23 }
 0x35f   : > { %v1785_v42 = vmul.f32 %v1777_v60, %v1585_v12  ;;  %v1739_v0 = vmul.f32 %v2261_v5, %v1699_v8 }
 0x360   : > { %v1770_v7 = vsel %vm1754_vm10, %v1762_v58, %v1746_v31  ;;  %v1692_v4 = vadd.f32 0.2548296, %v1684_v45 }
 0x361   : > { %1793 = vst [vmem:[%s3062_s11 + $0x20] sm:$0xff] %v1785_v42  ;;  %v1778_v41 = vadd.f32 1.0, %v1770_v7  ;;  %v1747_v11 = vsub.f32 1.0, %v1739_v0 }
 0x362   : > { %v1700_v51 = vmul.f32 %v3069_v27, %v1692_v4  ;;  %v1588_v27 = vmul.f32 0.5, %v3007_v25 }
 0x363   : > { %v1786_v33 = vmul.f32 %v1778_v41, %v1586_v15  ;;  %v1763_v32 = vsub.f32 0.0, %v1747_v11 }
 0x364   : > { %v1740_v19 = vmul.f32 %v2263_v36, %v1700_v51 }
 0x365   : > { %1794 = vst [vmem:[%s3062_s11 + $0x28] sm:$0xff] %v1786_v33  ;;  %v1771_v53 = vsel %vm1755_vm11, %v1763_v32, %v1747_v11 }
 0x366   : > { %v1779_v17 = vadd.f32 1.0, %v1771_v53  ;;  %v1748_v62 = vsub.f32 1.0, %v1740_v19 }
 0x368   : > { %v1787_v30 = vmul.f32 %v1779_v17, %v1587_v35  ;;  %v1764_v40 = vsub.f32 0.0, %v1748_v62 }
 0x36a   : > { %1795 = vst [vmem:[%s3062_s11 + $0x30] sm:$0xff] %v1787_v30  ;;  %v1772_v24 = vsel %vm1756_vm12, %v1764_v40, %v1748_v62 }
 0x36b   : > { %v1780_v37 = vadd.f32 1.0, %v1772_v24 }
 0x36d   : > { %v1788_v21 = vmul.f32 %v1780_v37, %v1588_v27 }
 0x36f   : > { %1796 = vst [vmem:[%s3062_s11 + $0x38] sm:$0x7f] %v1788_v21 }
 0x370 PF: > { %s15_s18 = sadd.s32 1, %s2270_s18  }
 0x371   : > { %p12_p4 = scmp.ge.s32.totalorder %s15_s18, 4  }
 0x373   :  { %14 = sbr.rel (!%p12_p4) target bundleno = 1 (0x1), region = 140 }

</bundles_post_ra>
